<compile_context>
chip_gen: v7x
topology: tpu7x:2x2x1
jax: 0.10.0
libtpu: 0.0.40
codegen_flags: <defaults>
</compile_context>

<pallas_src>
import functools

import jax
import jax.numpy as jnp
from jax import lax
from jax.experimental import pallas as pl
from jax.experimental.pallas import tpu as pltpu

HIDDEN = 1024          # bart-large hidden size (fc1 input)
FC1_OUT = 512
N_CLASSES = 2
LANE = 128             # lane-dense padded class dimension for fc2 / output
B_TILE = 8             # batch tile (8 sublanes; >=2 parallel tiles once B>=16)
S_TILE = 512           # sequence tile -> 8 MiB bf16 hidden-state block / step
VMEM_LIMIT_BYTES = 32 * 1024 * 1024   # explicit budget, fits v5e/v6e/v7x


def _round_up(x, m):
    return ((x + m - 1) // m) * m


def _head_kernel(hs_ref, w1_ref, b1_ref, w2_ref, b2_ref, out_ref, acc_ref, *,
                 inv_s):
    """Streaming mean-pool + fc1 + ReLU + (eval) dropout + fc2 + LogSoftmax.

    hs_ref : [B_TILE, TS, H]  bfloat16   (one sequence tile)
    w1_ref : [H, 512]         bfloat16   (resident: constant block index)
    b1_ref : [1, 512]         float32
    w2_ref : [512, LANE]      bfloat16   (zero-padded columns beyond N_CLASSES)
    b2_ref : [1, LANE]        float32    (padded lanes carry -1e30)
    out_ref: [B_TILE, LANE]   float32    (log-probabilities, padded lanes junk)
    acc_ref: [B_TILE, H]      float32    pool-sum accumulator scratch
    """
    s_idx = pl.program_id(1)

    @pl.when(s_idx == 0)
    def _():
        acc_ref[...] = jnp.zeros_like(acc_ref)

    # Pool-sum of this sequence tile on the (otherwise idle) MXU: contract the
    # bf16 tile's sequence axis against a bf16 ones vector, accumulating in
    # f32.  Zero-padded sequence rows contribute nothing; we scale by
    # 1/true_S at the end.  Keeping this off the VPU keeps v7x HBM-bound.
    bt, ts, _ = hs_ref.shape
    ones = jnp.ones((bt, 1, ts), jnp.bfloat16)
    tile_sum = lax.dot_general(
        ones, hs_ref[...],
        dimension_numbers=(((2,), (1,)), ((0,), (0,))),
        preferred_element_type=jnp.float32)            # [bt, 1, H]
    acc_ref[...] += tile_sum[:, 0, :]

    @pl.when(s_idx == pl.num_programs(1) - 1)
    def _():
        pooled = (acc_ref[...] * inv_s).astype(jnp.bfloat16)   # [B_TILE, H]

        # fc1 (MXU bf16 inputs, f32 accumulation) + ReLU
        x = jnp.dot(pooled, w1_ref[...],
                    preferred_element_type=jnp.float32) + b1_ref[...]
        x = jnp.maximum(x, 0.0)

        # dropout(p=0.1): identity in eval mode.

        # fc2 into a lane-dense [B_TILE, 128] buffer (bf16 operands, f32
        # accumulate).  Padded lanes get -1e30 from the f32 padded bias so
        # they contribute nothing to the log-softmax; logits stay f32.
        logits = jnp.dot(x.astype(jnp.bfloat16), w2_ref[...],
                         preferred_element_type=jnp.float32) + b2_ref[...]

        # LogSoftmax over the class axis (numerically stable, f32).
        m = jnp.max(logits, axis=1, keepdims=True)
        shifted = logits - m
        lse = jnp.log(jnp.sum(jnp.exp(shifted), axis=1, keepdims=True))
        out_ref[...] = shifted - lse


def bart_arch_head(hidden_states, w1, b1, w2, b2):
    """Runs the classification head as one tiled, pipelined Pallas call."""
    B, S, H = hidden_states.shape
    assert H == HIDDEN

    # Stream the hidden states and weights as bf16; accumulation/softmax f32.
    hs = hidden_states.astype(jnp.bfloat16)
    w1_b = w1.astype(jnp.bfloat16)
    b1_2d = b1.reshape(1, FC1_OUT).astype(jnp.float32)

    # Lane-dense padded fc2 parameters (weights bf16, bias f32 for the -1e30).
    w2_pad = jnp.zeros((FC1_OUT, LANE), jnp.bfloat16)
    w2_pad = w2_pad.at[:, :N_CLASSES].set(w2.astype(jnp.bfloat16))
    b2_pad = jnp.full((1, LANE), -1e30, jnp.float32)
    b2_pad = b2_pad.at[0, :N_CLASSES].set(b2.astype(jnp.float32))

    # Pad batch / sequence so they tile evenly (zero rows are harmless: they
    # add 0 to the pool sum; padded batch rows are sliced off below).  bf16
    # packs [16, 128] sublanes per vreg -> round short sequences to 16.
    ts = S_TILE if S >= S_TILE else _round_up(S, 16)
    b_pad = _round_up(B, B_TILE)
    s_pad = _round_up(S, ts)
    if (b_pad, s_pad) != (B, S):
        hs = jnp.pad(hs, ((0, b_pad - B), (0, s_pad - S), (0, 0)))

    grid = (b_pad // B_TILE, s_pad // ts)
    kernel = functools.partial(_head_kernel, inv_s=1.0 / S)

    out = pl.pallas_call(
        kernel,
        out_shape=jax.ShapeDtypeStruct((b_pad, LANE), jnp.float32),
        grid_spec=pltpu.PrefetchScalarGridSpec(
            num_scalar_prefetch=0,
            grid=grid,
            in_specs=[
                pl.BlockSpec((B_TILE, ts, H), lambda b, s: (b, s, 0)),
                pl.BlockSpec((H, FC1_OUT), lambda b, s: (0, 0)),
                pl.BlockSpec((1, FC1_OUT), lambda b, s: (0, 0)),
                pl.BlockSpec((FC1_OUT, LANE), lambda b, s: (0, 0)),
                pl.BlockSpec((1, LANE), lambda b, s: (0, 0)),
            ],
            out_specs=pl.BlockSpec((B_TILE, LANE), lambda b, s: (b, 0)),
            scratch_shapes=[pltpu.VMEM((B_TILE, HIDDEN), jnp.float32)],
        ),
        compiler_params=pltpu.CompilerParams(
            dimension_semantics=("parallel", "arbitrary"),
            vmem_limit_bytes=VMEM_LIMIT_BYTES),
    )(hs, w1_b, b1_2d, w2_pad, b2_pad)

    return out[:B, :N_CLASSES]


def synthetic_bart_backbone(sent_id, mask, embed_table):
    """Deterministic stand-in for `_, cls_hs = self.bart(sent_id, mask)`.

    Produces [B, S, HIDDEN] hidden states: embedding lookup gated by the
    attention mask.  Plain-JAX glue (not the hot path).
    """
    hs = embed_table[sent_id]                          # [B, S, H]
    hs = hs * mask[..., None].astype(hs.dtype)
    return hs


def init_params(key):
    """Deterministic init matching the shapes in BART_Arch.__init__."""
    k_emb, k_w1, k_b1, k_w2, k_b2 = jax.random.split(key, 5)
    vocab = 64
    embed_table = jax.random.normal(k_emb, (vocab, HIDDEN), jnp.float32) * 0.02

    # nn.Linear default: U(-1/sqrt(fan_in), 1/sqrt(fan_in))
    bound1 = 1.0 / jnp.sqrt(HIDDEN)
    w1 = jax.random.uniform(k_w1, (HIDDEN, FC1_OUT), jnp.float32, -bound1, bound1)
    b1 = jax.random.uniform(k_b1, (FC1_OUT,), jnp.float32, -bound1, bound1)

    bound2 = 1.0 / jnp.sqrt(FC1_OUT)
    w2 = jax.random.uniform(k_w2, (HIDDEN // 2, N_CLASSES), jnp.float32, -bound2, bound2)
    b2 = jax.random.uniform(k_b2, (N_CLASSES,), jnp.float32, -bound2, bound2)
    return embed_table, w1, b1, w2, b2


def reference_head(hidden_states, w1, b1, w2, b2):
    """Pure-JAX reference for the correctness check."""
    pooled = jnp.mean(hidden_states.astype(jnp.float32), axis=1)
    x = jnp.maximum(pooled @ w1.astype(jnp.float32) + b1, 0.0)
    logits = x @ w2 + b2
    return jax.nn.log_softmax(logits, axis=1)


if __name__ == "__main__":
    key = jax.random.PRNGKey(0)
    k_params, k_ids = jax.random.split(key)

    B, S = 2, 8
    embed_table, w1, b1, w2, b2 = init_params(k_params)

    sent_id = jax.random.randint(k_ids, (B, S), 0, 64, dtype=jnp.int32)
    mask = jnp.ones((B, S), dtype=jnp.int32)

    hidden_states = synthetic_bart_backbone(sent_id, mask, embed_table)

    # The kernel streams hidden states / w1 / w2 as bf16; compare against a
    # reference computed from the same bf16-rounded inputs.
    hs_bf16 = hidden_states.astype(jnp.bfloat16)

    out = bart_arch_head(hs_bf16, w1, b1, w2, b2)
    out = jax.block_until_ready(out)

    ref = reference_head(hs_bf16.astype(jnp.float32),
                         w1.astype(jnp.bfloat16).astype(jnp.float32),
                         b1,
                         w2.astype(jnp.bfloat16).astype(jnp.float32),
                         b2)

    assert out.shape == (B, N_CLASSES)
    assert bool(jnp.allclose(out, ref, atol=1e-2, rtol=1e-2)), "mismatch vs reference"

    print("KERNEL_OK")
</pallas_src>

<mosaic_0001>
module attributes {stable_mosaic.version = 11 : i64} {
  func.func @_head_kernel(%arg0: i32, %arg1: i32, %arg2: memref<8x16x1024xbf16, #tpu.memory_space<vmem>>, %arg3: memref<1024x512xbf16, #tpu.memory_space<vmem>>, %arg4: memref<1x512xf32, #tpu.memory_space<vmem>>, %arg5: memref<512x128xbf16, #tpu.memory_space<vmem>>, %arg6: memref<1x128xf32, #tpu.memory_space<vmem>>, %arg7: memref<8x128xf32, #tpu.memory_space<vmem>>, %arg8: memref<8x1024xf32, #tpu.memory_space<vmem>>) attributes {dimension_semantics = [#tpu.dimension_semantics<parallel>, #tpu.dimension_semantics<arbitrary>], iteration_bounds = array<i64: 1, 1>, scalar_prefetch = 0 : i64, scratch_operands = 1 : i64, tpu.core_type = #tpu.core_type<tc>, window_params = [{transform_indices = @transform_0, window_bounds = array<i64: 8, 16, 1024>}, {pipeline_mode = #tpu.pipeline_mode<synchronous>, transform_indices = @transform_1, window_bounds = array<i64: 1024, 512>}, {pipeline_mode = #tpu.pipeline_mode<synchronous>, transform_indices = @transform_2, window_bounds = array<i64: 1, 512>}, {pipeline_mode = #tpu.pipeline_mode<synchronous>, transform_indices = @transform_3, window_bounds = array<i64: 512, 128>}, {pipeline_mode = #tpu.pipeline_mode<synchronous>, transform_indices = @transform_4, window_bounds = array<i64: 1, 128>}, {transform_indices = @transform_5, window_bounds = array<i64: 8, 128>}]} {
    %c0_i32 = arith.constant 0 : i32
    %0 = arith.cmpi eq, %arg1, %c0_i32 : i32
    %1 = arith.extui %0 : i1 to i32
    %c0_i32_0 = arith.constant 0 : i32
    %2 = arith.cmpi ne, %1, %c0_i32_0 : i32
    scf.if %2 {
      %cst_10 = arith.constant 0.000000e+00 : f32
      %13 = vector.broadcast %cst_10 : f32 to vector<8x1024xf32>
      %c0_11 = arith.constant 0 : index
      %c0_12 = arith.constant 0 : index
      %14 = vector.load %arg8[%c0_11, %c0_12] : memref<8x1024xf32, #tpu.memory_space<vmem>>, vector<8x1024xf32>
      tpu.vector_store %arg8[%c0_11, %c0_12], %13 {strides = array<i32>} : memref<8x1024xf32, #tpu.memory_space<vmem>>, vector<8x1024xf32>,
    } else {
    }
    %cst = arith.constant 1.000000e+00 : bf16
    %3 = vector.broadcast %cst : bf16 to vector<8x1x16xbf16>
    %c0 = arith.constant 0 : index
    %c0_1 = arith.constant 0 : index
    %c0_2 = arith.constant 0 : index
    %4 = vector.load %arg2[%c0, %c0_1, %c0_2] : memref<8x16x1024xbf16, #tpu.memory_space<vmem>>, vector<8x16x1024xbf16>
    %cst_3 = arith.constant dense<0.000000e+00> : vector<8x1x1024xf32>
    %5 = tpu.matmul %3, %4, %cst_3 {dimension_numbers = #tpu.dot_dimension_numbers<[2], [1], [1], [2], [0, 0, 0, 1, 1, 2], [0], [0]>} : vector<8x1x16xbf16>, vector<8x16x1024xbf16>, vector<8x1x1024xf32> -> vector<8x1x1024xf32>
    %c0_4 = arith.constant 0 : index
    %c0_5 = arith.constant 0 : index
    %6 = vector.load %arg8[%c0_4, %c0_5] : memref<8x1024xf32, #tpu.memory_space<vmem>>, vector<8x1024xf32>
    %7 = vector.shape_cast %5 : vector<8x1x1024xf32> to vector<8x1024xf32>
    %8 = arith.addf %6, %7 : vector<8x1024xf32>
    %c0_6 = arith.constant 0 : index
    %c0_7 = arith.constant 0 : index
    %9 = vector.load %arg8[%c0_6, %c0_7] : memref<8x1024xf32, #tpu.memory_space<vmem>>, vector<8x1024xf32>
    tpu.vector_store %arg8[%c0_6, %c0_7], %8 {strides = array<i32>} : memref<8x1024xf32, #tpu.memory_space<vmem>>, vector<8x1024xf32>,
    %c0_i32_8 = arith.constant 0 : i32
    %10 = arith.cmpi eq, %arg1, %c0_i32_8 : i32
    %11 = arith.extui %10 : i1 to i32
    %c0_i32_9 = arith.constant 0 : i32
    %12 = arith.cmpi ne, %11, %c0_i32_9 : i32
    scf.if %12 {
      %c0_10 = arith.constant 0 : index
      %c0_11 = arith.constant 0 : index
      %13 = vector.load %arg8[%c0_10, %c0_11] : memref<8x1024xf32, #tpu.memory_space<vmem>>, vector<8x1024xf32>
      %cst_12 = arith.constant 1.250000e-01 : f32
      %14 = vector.broadcast %cst_12 : f32 to vector<8x1024xf32>
      %15 = arith.mulf %13, %14 : vector<8x1024xf32>
      %16 = arith.truncf %15 : vector<8x1024xf32> to vector<8x1024xbf16>
      %c0_13 = arith.constant 0 : index
      %c0_14 = arith.constant 0 : index
      %17 = vector.load %arg3[%c0_13, %c0_14] : memref<1024x512xbf16, #tpu.memory_space<vmem>>, vector<1024x512xbf16>
      %cst_15 = arith.constant dense<0.000000e+00> : vector<8x512xf32>
      %18 = tpu.matmul %16, %17, %cst_15 {dimension_numbers = #tpu.dot_dimension_numbers<[1], [0], [0], [1], [0, 0, 1, 1], [], []>} : vector<8x1024xbf16>, vector<1024x512xbf16>, vector<8x512xf32> -> vector<8x512xf32>
      %c0_16 = arith.constant 0 : index
      %c0_17 = arith.constant 0 : index
      %19 = vector.load %arg4[%c0_16, %c0_17] : memref<1x512xf32, #tpu.memory_space<vmem>>, vector<1x512xf32>
      %20 = vector.broadcast %19 : vector<1x512xf32> to vector<8x512xf32>
      %21 = arith.addf %18, %20 : vector<8x512xf32>
      %cst_18 = arith.constant 0.000000e+00 : f32
      %22 = vector.broadcast %cst_18 : f32 to vector<8x512xf32>
      %23 = arith.maximumf %21, %22 : vector<8x512xf32>
      %24 = arith.truncf %23 : vector<8x512xf32> to vector<8x512xbf16>
      %c0_19 = arith.constant 0 : index
      %c0_20 = arith.constant 0 : index
      %25 = vector.load %arg5[%c0_19, %c0_20] : memref<512x128xbf16, #tpu.memory_space<vmem>>, vector<512x128xbf16>
      %cst_21 = arith.constant dense<0.000000e+00> : vector<8x128xf32>
      %26 = tpu.matmul %24, %25, %cst_21 {dimension_numbers = #tpu.dot_dimension_numbers<[1], [0], [0], [1], [0, 0, 1, 1], [], []>} : vector<8x512xbf16>, vector<512x128xbf16>, vector<8x128xf32> -> vector<8x128xf32>
      %c0_22 = arith.constant 0 : index
      %c0_23 = arith.constant 0 : index
      %27 = vector.load %arg6[%c0_22, %c0_23] : memref<1x128xf32, #tpu.memory_space<vmem>>, vector<1x128xf32>
      %28 = vector.broadcast %27 : vector<1x128xf32> to vector<8x128xf32>
      %29 = arith.addf %26, %28 : vector<8x128xf32>
      %cst_24 = arith.constant dense<0xFF800000> : vector<8xf32>
      %30 = vector.multi_reduction <maximumf>, %29, %cst_24 [1] : vector<8x128xf32> to vector<8xf32>
      %31 = vector.shape_cast %30 : vector<8xf32> to vector<8x1xf32>
      %32 = vector.broadcast %31 : vector<8x1xf32> to vector<8x128xf32>
      %33 = arith.subf %29, %32 : vector<8x128xf32>
      %34 = math.exp %33 : vector<8x128xf32>
      %cst_25 = arith.constant dense<0.000000e+00> : vector<8xf32>
      %35 = vector.multi_reduction <add>, %34, %cst_25 [1] : vector<8x128xf32> to vector<8xf32>
      %36 = vector.shape_cast %35 : vector<8xf32> to vector<8x1xf32>
      %37 = math.log %36 : vector<8x1xf32>
      %38 = vector.broadcast %37 : vector<8x1xf32> to vector<8x128xf32>
      %39 = arith.subf %33, %38 : vector<8x128xf32>
      %c0_26 = arith.constant 0 : index
      %c0_27 = arith.constant 0 : index
      %40 = vector.load %arg7[%c0_26, %c0_27] : memref<8x128xf32, #tpu.memory_space<vmem>>, vector<8x128xf32>
      tpu.vector_store %arg7[%c0_26, %c0_27], %39 {strides = array<i32>} : memref<8x128xf32, #tpu.memory_space<vmem>>, vector<8x128xf32>,
    } else {
    }
    return
  }
  func.func @transform_0(%arg0: i32, %arg1: i32) -> (i32, i32, i32) {
    %c0_i32 = arith.constant 0 : i32
    %c0_i32_0 = arith.constant 0 : i32
    return %arg0, %arg1, %c0_i32 : i32, i32, i32
  }
  func.func @transform_1(%arg0: i32, %arg1: i32) -> (i32, i32) {
    %c0_i32 = arith.constant 0 : i32
    %c0_i32_0 = arith.constant 0 : i32
    %c0_i32_1 = arith.constant 0 : i32
    return %c0_i32, %c0_i32_0 : i32, i32
  }
  func.func @transform_2(%arg0: i32, %arg1: i32) -> (i32, i32) {
    %c0_i32 = arith.constant 0 : i32
    %c0_i32_0 = arith.constant 0 : i32
    %c0_i32_1 = arith.constant 0 : i32
    return %c0_i32, %c0_i32_0 : i32, i32
  }
  func.func @transform_3(%arg0: i32, %arg1: i32) -> (i32, i32) {
    %c0_i32 = arith.constant 0 : i32
    %c0_i32_0 = arith.constant 0 : i32
    %c0_i32_1 = arith.constant 0 : i32
    return %c0_i32, %c0_i32_0 : i32, i32
  }
  func.func @transform_4(%arg0: i32, %arg1: i32) -> (i32, i32) {
    %c0_i32 = arith.constant 0 : i32
    %c0_i32_0 = arith.constant 0 : i32
    %c0_i32_1 = arith.constant 0 : i32
    return %c0_i32, %c0_i32_0 : i32, i32
  }
  func.func @transform_5(%arg0: i32, %arg1: i32) -> (i32, i32) {
    %c0_i32 = arith.constant 0 : i32
    %c0_i32_0 = arith.constant 0 : i32
    return %arg0, %c0_i32 : i32, i32
  }
}

</mosaic_0001>

<bundles_post_ra>
// kernel: tpu_custom_call.1
= control target key start
LH: loop header
LB: loop body
LE: loop exit
PB: predicated region body
PF: predicated region fallthrough
CT: control target
= control target key end

     0   :  { %10 = vsyncpa [#allocation4], 0  ;;  %s5528_s0 = inlined_call_operand.hbm [shape: bf16[8,16,1024], index: 0, kind: input, shape index: {}]   ;;  %s5529_s1 = inlined_call_operand.hbm [shape: bf16[1024,512], index: 1, kind: input, shape index: {}]   ;;  %s5530_s2 = inlined_call_operand.vmem [shape: f32[1,512], index: 2, kind: input, shape index: {}]   ;;  %s5531_s3 = inlined_call_operand.hbm [shape: bf16[512,128], index: 3, kind: input, shape index: {}]   ;;  %s5532_s4 = inlined_call_operand.vmem [shape: f32[1,128], index: 4, kind: input, shape index: {}]   ;;  %s5533_s5 = inlined_call_operand.hbm [shape: f32[8,128], index: 5, kind: output, shape index: {}]  }
   0x1   :  { %11 = vsyncpa [#allocation7], 0 }
   0x2   :  { %12 = vsyncpa [#allocation5], 0  ;;  %s5265_s18 = smov [#allocation6]   ;;  %s5171_s22 = scalar_lea.hbm %s5529_s1, 32768 }
   0x3   :  { %s30_s19 = sshll.u32 %s5265_s18, 4  ;;  %p5172_p0 = scmp.ne.s32.totalorder %s5529_s1, %s5171_s22  ;;  %s31_s19 = int_to_ptr.vmem [resolvable:$true] %s30_s19 }
   0x4   :  { %p5175_p1 = scmp.lt.u32.totalorder %s5171_s22, %s5529_s1 }
   0x6   :  { %p5177_p2 = pnand %p5175_p1, %p5172_p0 }
   0x8   :  { %5180 = shalt.err (!%p5177_p2)
}
   0x9   :  { %s5181_s27 = scalar_lea.vmem %s31_s19, 32768  ;;  %p5186_p4 = scmp.lt.s32.totalorder %s31_s19, %s31_s19 }
   0xa   :  { %p5182_p3 = scmp.ne.s32.totalorder %s31_s19, %s5181_s27  ;;  %p5187_p5 = scmp.lt.s32.totalorder %s5181_s27, %s5181_s27 }
   0xc   :  { %p5188_p6 = por %p5187_p5, %p5186_p4 }
   0xe   :  { %p5189_p7 = pnand %p5188_p6, %p5182_p3 }
  0x10   :  { %5192 = shalt.err (!%p5189_p7)
}
  0x11   :  { %s5266_s28 = smov 256   ;;  %s5267_s29 = smov 16  }
  0x12   :  { %36 = dma.hbm_to_vmem [thread:$0]  %s5529_s1, 32768, %s31_s19, [#allocation7], %s5266_s28, %s5266_s28, %s5267_s29  }
  0x13   :  { %s5268_s7 = smov [#allocation3]   ;;  %s5193_s11 = scalar_lea.hbm %s5528_s0, 8192 }
  0x14   :  { %s18_s8 = sshll.u32 %s5268_s7, 4  ;;  %p5194_p8 = scmp.ne.s32.totalorder %s5528_s0, %s5193_s11  ;;  %s19_s8 = int_to_ptr.vmem [resolvable:$true] %s18_s8 }
  0x15   :  { %p5197_p9 = scmp.lt.u32.totalorder %s5193_s11, %s5528_s0 }
  0x17   :  { %p5199_p10 = pnand %p5197_p9, %p5194_p8 }
  0x19   :  { %5202 = shalt.err (!%p5199_p10)
}
  0x1a   :  { %s5203_s16 = scalar_lea.vmem %s19_s8, 8192  ;;  %p5208_p12 = scmp.lt.s32.totalorder %s19_s8, %s19_s8 }
  0x1b   :  { %p5204_p11 = scmp.ne.s32.totalorder %s19_s8, %s5203_s16  ;;  %p5209_p13 = scmp.lt.s32.totalorder %s5203_s16, %s5203_s16 }
  0x1d   :  { %p5210_p0 = por %p5209_p13, %p5208_p12 }
  0x1f   :  { %p5211_p1 = pnand %p5210_p0, %p5204_p11 }
  0x21   :  { %5214 = shalt.err (!%p5211_p1)
}
  0x22   :  { %s5269_s1 = smov 512   ;;  %s5270_s17 = smov 32  }
  0x23   :  { %24 = dma.hbm_to_vmem [thread:$0]  %s5528_s0, 8192, %s19_s8, [#allocation4], %s5269_s1, %s5269_s1, %s5270_s17  }
  0x24   :  { %s5271_s20 = smov [#allocation8]   ;;  %s5215_s24 = scalar_lea.hbm %s5531_s3, 4096 }
  0x25   :  { %s44_s21 = sshll.u32 %s5271_s20, 4  ;;  %p5216_p2 = scmp.ne.s32.totalorder %s5531_s3, %s5215_s24  ;;  %s45_s21 = int_to_ptr.vmem [resolvable:$true] %s44_s21 }
  0x26   :  { %p5219_p3 = scmp.lt.u32.totalorder %s5215_s24, %s5531_s3 }
  0x28   :  { %p5221_p4 = pnand %p5219_p3, %p5216_p2 }
  0x2a   :  { %5224 = shalt.err (!%p5221_p4)
}
  0x2b   :  { %s5225_s29 = scalar_lea.vmem %s45_s21, 4096  ;;  %p5230_p6 = scmp.lt.s32.totalorder %s45_s21, %s45_s21 }
  0x2c   :  { %p5226_p5 = scmp.ne.s32.totalorder %s45_s21, %s5225_s29  ;;  %p5231_p7 = scmp.lt.s32.totalorder %s5225_s29, %s5225_s29 }
  0x2e   :  { %p5232_p8 = por %p5231_p7, %p5230_p6 }
  0x30   :  { %p5233_p9 = pnand %p5232_p8, %p5226_p5 }
  0x32   :  { %5236 = shalt.err (!%p5233_p9)
}
  0x33   :  { %s5272_s0 = smov 64   ;;  %s5273_s30 = smov 4  }
  0x34   :  { %50 = dma.hbm_to_vmem [thread:$0]  %s5531_s3, 4096, %s45_s21, [#allocation7], %s5272_s0, %s5272_s0, %s5273_s30  }
  0x35   :  { %5259 = dma.done.wait [#allocation4], 8192  }
  0x36   :  { %5260 = vsyncadd [#allocation4], 4294959104 }
  0x37   :  { %5261 = dma.done.wait [#allocation7], 36864  }
  0x38   :  { %5262 = vsyncadd [#allocation7], 4294930432  ;;  %v5274_v0 = vmov 0   ;;  %v76_v1 = vld [vmem:[#allocation3] sm:$0xff]  ;;  %v77_v3 = vld [vmem:[#allocation3 + $0x8] sm:$0xff]  ;;  %vm180_vm0 = vcmask 130048  }
  0x39   :  { %216 = vmatprep.mubr.bf16.mxu0 %v5274_v0  ;;  %257 = vmatprep.mubr.bf16.mxu1 %v5274_v0  ;;  %v80_v2 = vld [vmem:[#allocation3 + $0x20] sm:$0xff]  ;;  %v81_v5 = vld [vmem:[#allocation3 + $0x28] sm:$0xff]  ;;  %v78_v7 = vld [vmem:[#allocation3 + $0x10] sm:$0xff]  ;;  %v5275_v22 = vmov 1065369472   ;;  %vm1849_vm1 = vcmask 1041409  }
  0x3a   :  { %v4283_v4 = vcombine.high %v76_v1, %v80_v2  ;;  %v4282_v6 = vcombine.low %v76_v1, %v80_v2  ;;  %v82_v8 = vld [vmem:[#allocation3 + $0x30] sm:$0xff]  ;;  %v4285_v9 = vcombine.high %v77_v3, %v81_v5  ;;  %v4284_v10 = vcombine.low %v77_v3, %v81_v5  ;;  %v79_v12 = vld [vmem:[#allocation3 + $0x18] sm:$0xff]  ;;  %v84_v15 = vld [vmem:[#allocation3 + $0x40] sm:$0xff] }
  0x3b   :  { %v4287_v11 = vcombine.high %v78_v7, %v82_v8  ;;  %v83_v13 = vld [vmem:[#allocation3 + $0x38] sm:$0xff]  ;;  %v88_v16 = vld [vmem:[#allocation3 + $0x60] sm:$0xff]  ;;  %v4286_v17 = vcombine.low %v78_v7, %v82_v8  ;;  %v85_v18 = vld [vmem:[#allocation3 + $0x48] sm:$0xff]  ;;  %vm1852_vm2 = vcmask 1042434   ;;  %vm1855_vm3 = vcmask 1043459  }
  0x3c   :  { %184 = vmatprep.subr.bf16.mxu0 %v4283_v4  ;;  %v4289_v14 = vcombine.high %v79_v12, %v83_v13  ;;  %225 = vmatprep.subr.bf16.mxu1 %v4285_v9  ;;  %v89_v19 = vld [vmem:[#allocation3 + $0x68] sm:$0xff]  ;;  %v4288_v20 = vcombine.low %v79_v12, %v83_v13  ;;  %v4295_v21 = vcombine.high %v84_v15, %v88_v16  ;;  %v86_v24 = vld [vmem:[#allocation3 + $0x50] sm:$0xff]  ;;  %v87_v27 = vld [vmem:[#allocation3 + $0x58] sm:$0xff]  ;;  %vm1858_vm4 = vcmask 1044484  }
  0x3d   :  { %185 = vmatpush1.bf16.msra.mxu0 %v4282_v6  ;;  %226 = vmatpush1.bf16.msra.mxu1 %v4284_v10  ;;  %v4297_v23 = vcombine.high %v85_v18, %v89_v19  ;;  %v90_v25 = vld [vmem:[#allocation3 + $0x70] sm:$0xff]  ;;  %v4294_v26 = vcombine.low %v84_v15, %v88_v16  ;;  %v91_v28 = vld [vmem:[#allocation3 + $0x78] sm:$0xff]  ;;  %v4296_v29 = vcombine.low %v85_v18, %v89_v19  ;;  %v92_v32 = vld [vmem:[#allocation3 + $0x80] sm:$0xff]  ;;  %vm1861_vm5 = vcmask 1045509  }
  0x3e   :  { %266 = vmatprep.subr.bf16.mxu0 %v4287_v11  ;;  %307 = vmatprep.subr.bf16.mxu1 %v4289_v14  ;;  %v4299_v30 = vcombine.high %v86_v24, %v90_v25  ;;  %v4301_v31 = vcombine.high %v87_v27, %v91_v28  ;;  %v96_v33 = vld [vmem:[#allocation3 + $0xa0] sm:$0xff]  ;;  %v4298_v34 = vcombine.low %v86_v24, %v90_v25  ;;  %v93_v35 = vld [vmem:[#allocation3 + $0x88] sm:$0xff]  ;;  %v94_v40 = vld [vmem:[#allocation3 + $0x90] sm:$0xff]  ;;  %vm1864_vm6 = vcmask 1046534  }
  0x3f   :  { %v97_v36 = vld [vmem:[#allocation3 + $0xa8] sm:$0xff]  ;;  %v4300_v37 = vcombine.low %v87_v27, %v91_v28  ;;  %v4307_v38 = vcombine.high %v92_v32, %v96_v33  ;;  %v98_v41 = vld [vmem:[#allocation3 + $0xb0] sm:$0xff]  ;;  %v95_v42 = vld [vmem:[#allocation3 + $0x98] sm:$0xff]  ;;  %v4306_v44 = vcombine.low %v92_v32, %v96_v33  ;;  %vm1867_vm7 = vcmask 1047559  }
  0x40   :  { %4290 = vmatmul.mubr.msk.bf16.vlgmr.msra.gmra.mrb[0].mxu0 %vm180_vm0, %v5275_v22  ;;  %4291 = vmatmul.mubr.msk.bf16.vlgmr.msra.gmra.mrb[0].mxu1 %vm180_vm0, %v5275_v22  ;;  %v4309_v39 = vcombine.high %v93_v35, %v97_v36  ;;  %v99_v43 = vld [vmem:[#allocation3 + $0xb8] sm:$0xff]  ;;  %v4308_v45 = vcombine.low %v93_v35, %v97_v36  ;;  %v4311_v46 = vcombine.high %v94_v40, %v98_v41  ;;  %v100_v48 = vld [vmem:[#allocation3 + $0xc0] sm:$0xff]  ;;  %v101_v50 = vld [vmem:[#allocation3 + $0xc8] sm:$0xff] }
  0x41   :  { %267 = vmatpush1.bf16.msra.mxu0 %v4286_v17  ;;  %308 = vmatpush1.bf16.msra.mxu1 %v4288_v20  ;;  %v4313_v47 = vcombine.high %v95_v42, %v99_v43  ;;  %v104_v49 = vld [vmem:[#allocation3 + $0xe0] sm:$0xff]  ;;  %v105_v51 = vld [vmem:[#allocation3 + $0xe8] sm:$0xff]  ;;  %v4310_v52 = vcombine.low %v94_v40, %v98_v41  ;;  %v4312_v53 = vcombine.low %v95_v42, %v99_v43  ;;  %v102_v56 = vld [vmem:[#allocation3 + $0xd0] sm:$0xff] }
  0x42   :  { %298 = vmatprep.mubr.bf16.mxu0 %v5274_v0  ;;  %339 = vmatprep.mubr.bf16.mxu1 %v5274_v0  ;;  %v4319_v54 = vcombine.high %v100_v48, %v104_v49  ;;  %v4321_v55 = vcombine.high %v101_v50, %v105_v51  ;;  %v106_v57 = vld [vmem:[#allocation3 + $0xf0] sm:$0xff]  ;;  %v103_v58 = vld [vmem:[#allocation3 + $0xd8] sm:$0xff]  ;;  %v4318_v60 = vcombine.low %v100_v48, %v104_v49  ;;  %v108_v1 = vld [vmem:[#allocation3 + $0x100] sm:$0xff] }
  0x43   :  { %388 = vmatprep.subr.bf16.mxu0 %v4295_v21  ;;  %429 = vmatprep.subr.bf16.mxu1 %v4297_v23  ;;  %v107_v59 = vld [vmem:[#allocation3 + $0xf8] sm:$0xff]  ;;  %v4320_v61 = vcombine.low %v101_v50, %v105_v51  ;;  %v4323_v62 = vcombine.high %v102_v56, %v106_v57  ;;  %v112_v2 = vld [vmem:[#allocation3 + $0x120] sm:$0xff]  ;;  %v109_v3 = vld [vmem:[#allocation3 + $0x108] sm:$0xff]  ;;  %v4322_v5 = vcombine.low %v102_v56, %v106_v57 }
  0x44   :  { %v4325_v63 = vcombine.high %v103_v58, %v107_v59  ;;  %v113_v4 = vld [vmem:[#allocation3 + $0x128] sm:$0xff]  ;;  %v4324_v6 = vcombine.low %v103_v58, %v107_v59  ;;  %v4331_v7 = vcombine.high %v108_v1, %v112_v2  ;;  %v110_v9 = vld [vmem:[#allocation3 + $0x110] sm:$0xff]  ;;  %v111_v11 = vld [vmem:[#allocation3 + $0x118] sm:$0xff]  ;;  %v4330_v13 = vcombine.low %v108_v1, %v112_v2 }
  0x45   :  { %v4333_v8 = vcombine.high %v109_v3, %v113_v4  ;;  %v114_v10 = vld [vmem:[#allocation3 + $0x130] sm:$0xff]  ;;  %v115_v12 = vld [vmem:[#allocation3 + $0x138] sm:$0xff]  ;;  %v4332_v14 = vcombine.low %v109_v3, %v113_v4  ;;  %v116_v17 = vld [vmem:[#allocation3 + $0x140] sm:$0xff] }
  0x46   :  { %v4335_v15 = vcombine.high %v110_v9, %v114_v10  ;;  %v4337_v16 = vcombine.high %v111_v11, %v115_v12  ;;  %v120_v18 = vld [vmem:[#allocation3 + $0x160] sm:$0xff]  ;;  %v117_v19 = vld [vmem:[#allocation3 + $0x148] sm:$0xff]  ;;  %v4334_v21 = vcombine.low %v110_v9, %v114_v10  ;;  %v4336_v23 = vcombine.low %v111_v11, %v115_v12  ;;  %v122_v27 = vld [vmem:[#allocation3 + $0x170] sm:$0xff] }
  0x47   :  { %v121_v20 = vld [vmem:[#allocation3 + $0x168] sm:$0xff]  ;;  %v4343_v24 = vcombine.high %v116_v17, %v120_v18  ;;  %v119_v28 = vld [vmem:[#allocation3 + $0x158] sm:$0xff]  ;;  %v128_v35 = vld [vmem:[#allocation3 + $0x1a0] sm:$0xff] }
  0x48   :  { %4292 = vmatmul.mubr.msk.bf16.vlgmr.msra.gmra.mrb[4].mxu0 %vm180_vm0, %v5275_v22  ;;  %4293 = vmatmul.mubr.msk.bf16.vlgmr.msra.gmra.mrb[4].mxu1 %vm180_vm0, %v5275_v22  ;;  %v4345_v25 = vcombine.high %v117_v19, %v121_v20  ;;  %v125_v36 = vld [vmem:[#allocation3 + $0x188] sm:$0xff]  ;;  %v126_v42 = vld [vmem:[#allocation3 + $0x190] sm:$0xff]  ;;  %v132_v50 = vld [vmem:[#allocation3 + $0x1c0] sm:$0xff] }
  0x49   :  { %389 = vmatpush1.bf16.msra.mxu0 %v4294_v26  ;;  %430 = vmatpush1.bf16.msra.mxu1 %v4296_v29  ;;  %v118_v26 = vld [vmem:[#allocation3 + $0x150] sm:$0xff]  ;;  %v123_v29 = vld [vmem:[#allocation3 + $0x178] sm:$0xff]  ;;  %v136_v51 = vld [vmem:[#allocation3 + $0x1e0] sm:$0xff] }
  0x4a   :  { %420 = vmatprep.mubr.bf16.mxu0 %v5274_v0  ;;  %461 = vmatprep.mubr.bf16.mxu1 %v5274_v0  ;;  %v4347_v32 = vcombine.high %v118_v26, %v122_v27  ;;  %v4349_v33 = vcombine.high %v119_v28, %v123_v29  ;;  %v130_v43 = vld [vmem:[#allocation3 + $0x1b0] sm:$0xff]  ;;  %v4367_v56 = vcombine.high %v132_v50, %v136_v51  ;;  %v4760_v11 = vld [vmem:[#allocation6 + $0x28] ss:$16 sps:$4 sm:$0xff]   ;;  %v4762_v12 = vld [vmem:[#allocation6 + $0x2c] ss:$16 sps:$4 sm:$0xff]  }
  0x4b   :  { %470 = vmatprep.subr.bf16.mxu0 %v4299_v30  ;;  %511 = vmatprep.subr.bf16.mxu1 %v4301_v31  ;;  %v4342_v30 = vcombine.low %v116_v17, %v120_v18  ;;  %v4344_v31 = vcombine.low %v117_v19, %v121_v20  ;;  %v4359_v48 = vcombine.high %v126_v42, %v130_v43  ;;  %v134_v58 = vld [vmem:[#allocation3 + $0x1d0] sm:$0xff]  ;;  %v4772_v18 = vld [vmem:[#allocation6 + $0x68] ss:$16 sps:$4 sm:$0xff]   ;;  %v4780_v20 = vld [vmem:[#allocation6 + $0x8c] ss:$16 sps:$4 sm:$0xff]  }
  0x4c   :  { %v138_v59 = vld [vmem:[#allocation3 + $0x1f0] sm:$0xff] }
  0x4d   :  { %v4371_v1 = vcombine.high %v134_v58, %v138_v59  ;;  %v4370_v3 = vcombine.low %v134_v58, %v138_v59  ;;  %v4757_v9 = vld [vmem:[#allocation6 + $0x20] ss:$16 sps:$4 sm:$0xff]   ;;  %v4759_v10 = vld [vmem:[#allocation6 + $0x24] ss:$16 sps:$4 sm:$0xff]   ;;  %v4832_v59 = vld [vmem:[#allocation6 + $0x1a8] ss:$16 sps:$4 sm:$0xff]  }
  0x4e   :  { %v4769_v17 = vld [vmem:[#allocation6 + $0x60] ss:$16 sps:$4 sm:$0xff]   ;;  %v4777_v19 = vld [vmem:[#allocation6 + $0x84] ss:$16 sps:$4 sm:$0xff]  }
  0x4f   :  { %v4829_v58 = vld [vmem:[#allocation6 + $0x1a0] ss:$16 sps:$4 sm:$0xff]  }
  0x50   :  { %4302 = vmatmul.mubr.msk.bf16.vlgmr.msra.gmra.mrb[8].mxu0 %vm180_vm0, %v5275_v22  ;;  %4303 = vmatmul.mubr.msk.bf16.vlgmr.msra.gmra.mrb[8].mxu1 %vm180_vm0, %v5275_v22 }
  0x51   :  { %471 = vmatpush1.bf16.msra.mxu0 %v4298_v34  ;;  %512 = vmatpush1.bf16.msra.mxu1 %v4300_v37  ;;  %v124_v34 = vld [vmem:[#allocation3 + $0x180] sm:$0xff]  ;;  %v129_v37 = vld [vmem:[#allocation3 + $0x1a8] sm:$0xff] }
  0x52   :  { %502 = vmatprep.mubr.bf16.mxu0 %v5274_v0  ;;  %543 = vmatprep.mubr.bf16.mxu1 %v5274_v0  ;;  %v4355_v40 = vcombine.high %v124_v34, %v128_v35  ;;  %v4357_v41 = vcombine.high %v125_v36, %v129_v37 }
  0x53   :  { %592 = vmatprep.subr.bf16.mxu0 %v4307_v38  ;;  %633 = vmatprep.subr.bf16.mxu1 %v4309_v39  ;;  %v4346_v38 = vcombine.low %v118_v26, %v122_v27  ;;  %v4348_v39 = vcombine.low %v119_v28, %v123_v29  ;;  %v4781_v26 = vld [vmem:[#allocation6 + $0xa0] ss:$16 sps:$4 sm:$0xff]   ;;  %v4784_v27 = vld [vmem:[#allocation6 + $0xa8] ss:$16 sps:$4 sm:$0xff]   ;;  %v4789_v28 = vld [vmem:[#allocation6 + $0xc4] ss:$16 sps:$4 sm:$0xff]  }
  0x54   :  { %v4792_v29 = vld [vmem:[#allocation6 + $0xcc] ss:$16 sps:$4 sm:$0xff]  }
  0x58   :  { %4304 = vmatmul.mubr.msk.bf16.vlgmr.msra.gmra.mrb[12].mxu0 %vm180_vm0, %v5275_v22  ;;  %4305 = vmatmul.mubr.msk.bf16.vlgmr.msra.gmra.mrb[12].mxu1 %vm180_vm0, %v5275_v22 }
  0x59   :  { %593 = vmatpush1.bf16.msra.mxu0 %v4306_v44  ;;  %634 = vmatpush1.bf16.msra.mxu1 %v4308_v45  ;;  %v127_v44 = vld [vmem:[#allocation3 + $0x198] sm:$0xff] }
  0x5a   :  { %624 = vmatprep.mubr.bf16.mxu0 %v5274_v0  ;;  %665 = vmatprep.mubr.bf16.mxu1 %v5274_v0  ;;  %v131_v45 = vld [vmem:[#allocation3 + $0x1b8] sm:$0xff] }
  0x5b   :  { %674 = vmatprep.subr.bf16.mxu0 %v4311_v46  ;;  %715 = vmatprep.subr.bf16.mxu1 %v4313_v47  ;;  %v4354_v46 = vcombine.low %v124_v34, %v128_v35  ;;  %v4356_v47 = vcombine.low %v125_v36, %v129_v37  ;;  %v4361_v49 = vcombine.high %v127_v44, %v131_v45  ;;  %v4793_v34 = vld [vmem:[#allocation6 + $0xe0] ss:$16 sps:$4 sm:$0xff]   ;;  %v4796_v35 = vld [vmem:[#allocation6 + $0xe8] ss:$16 sps:$4 sm:$0xff]   ;;  %v4801_v36 = vld [vmem:[#allocation6 + $0x104] ss:$16 sps:$4 sm:$0xff]  }
  0x5c   :  { %v4804_v37 = vld [vmem:[#allocation6 + $0x10c] ss:$16 sps:$4 sm:$0xff]  }
  0x60   :  { %4314 = vmatmul.mubr.msk.bf16.vlgmr.msra.gmra.mrb[16].mxu0 %vm180_vm0, %v5275_v22  ;;  %4315 = vmatmul.mubr.msk.bf16.vlgmr.msra.gmra.mrb[16].mxu1 %vm180_vm0, %v5275_v22 }
  0x61   :  { %675 = vmatpush1.bf16.msra.mxu0 %v4310_v52  ;;  %716 = vmatpush1.bf16.msra.mxu1 %v4312_v53  ;;  %v133_v52 = vld [vmem:[#allocation3 + $0x1c8] sm:$0xff] }
  0x62   :  { %706 = vmatprep.mubr.bf16.mxu0 %v5274_v0  ;;  %747 = vmatprep.mubr.bf16.mxu1 %v5274_v0  ;;  %v137_v53 = vld [vmem:[#allocation3 + $0x1e8] sm:$0xff] }
  0x63   :  { %796 = vmatprep.subr.bf16.mxu0 %v4319_v54  ;;  %837 = vmatprep.subr.bf16.mxu1 %v4321_v55  ;;  %v4358_v54 = vcombine.low %v126_v42, %v130_v43  ;;  %v4360_v55 = vcombine.low %v127_v44, %v131_v45  ;;  %v4369_v57 = vcombine.high %v133_v52, %v137_v53  ;;  %v4805_v42 = vld [vmem:[#allocation6 + $0x120] ss:$16 sps:$4 sm:$0xff]   ;;  %v4808_v43 = vld [vmem:[#allocation6 + $0x128] ss:$16 sps:$4 sm:$0xff]   ;;  %v4813_v44 = vld [vmem:[#allocation6 + $0x144] ss:$16 sps:$4 sm:$0xff]  }
  0x64   :  { %v4816_v45 = vld [vmem:[#allocation6 + $0x14c] ss:$16 sps:$4 sm:$0xff]  }
  0x68   :  { %4316 = vmatmul.mubr.msk.bf16.vlgmr.msra.gmra.mrb[20].mxu0 %vm180_vm0, %v5275_v22  ;;  %4317 = vmatmul.mubr.msk.bf16.vlgmr.msra.gmra.mrb[20].mxu1 %vm180_vm0, %v5275_v22 }
  0x69   :  { %797 = vmatpush1.bf16.msra.mxu0 %v4318_v60  ;;  %838 = vmatpush1.bf16.msra.mxu1 %v4320_v61  ;;  %v135_v60 = vld [vmem:[#allocation3 + $0x1d8] sm:$0xff] }
  0x6a   :  { %828 = vmatprep.mubr.bf16.mxu0 %v5274_v0  ;;  %869 = vmatprep.mubr.bf16.mxu1 %v5274_v0  ;;  %v139_v61 = vld [vmem:[#allocation3 + $0x1f8] sm:$0xff] }
  0x6b   :  { %878 = vmatprep.subr.bf16.mxu0 %v4323_v62  ;;  %919 = vmatprep.subr.bf16.mxu1 %v4325_v63  ;;  %v4366_v62 = vcombine.low %v132_v50, %v136_v51  ;;  %v4368_v63 = vcombine.low %v133_v52, %v137_v53  ;;  %v4373_v2 = vcombine.high %v135_v60, %v139_v61  ;;  %v4817_v50 = vld [vmem:[#allocation6 + $0x160] ss:$16 sps:$4 sm:$0xff]   ;;  %v4820_v51 = vld [vmem:[#allocation6 + $0x168] ss:$16 sps:$4 sm:$0xff]   ;;  %v4825_v52 = vld [vmem:[#allocation6 + $0x184] ss:$16 sps:$4 sm:$0xff]  }
  0x6c   :  { %v4372_v4 = vcombine.low %v135_v60, %v139_v61  ;;  %v4828_v53 = vld [vmem:[#allocation6 + $0x18c] ss:$16 sps:$4 sm:$0xff]   ;;  %v4837_v60 = vld [vmem:[#allocation6 + $0x1c4] ss:$16 sps:$4 sm:$0xff]  }
  0x6d   :  { %v4840_v61 = vld [vmem:[#allocation6 + $0x1cc] ss:$16 sps:$4 sm:$0xff]  }
  0x70   :  { %4326 = vmatmul.mubr.msk.bf16.vlgmr.msra.gmra.mrb[24].mxu0 %vm180_vm0, %v5275_v22  ;;  %4327 = vmatmul.mubr.msk.bf16.vlgmr.msra.gmra.mrb[24].mxu1 %vm180_vm0, %v5275_v22 }
  0x71   :  { %879 = vmatpush1.bf16.msra.mxu0 %v4322_v5  ;;  %920 = vmatpush1.bf16.msra.mxu1 %v4324_v6  ;;  %v4753_v5 = vld [vmem:[#allocation6 + $0x4] ss:$16 sps:$4 sm:$0xff]   ;;  %v4756_v6 = vld [vmem:[#allocation6 + $0xc] ss:$16 sps:$4 sm:$0xff]  }
  0x72   :  { %910 = vmatprep.mubr.bf16.mxu0 %v5274_v0  ;;  %951 = vmatprep.mubr.bf16.mxu1 %v5274_v0 }
  0x73   :  { %1000 = vmatprep.subr.bf16.mxu0 %v4331_v7  ;;  %1041 = vmatprep.subr.bf16.mxu1 %v4333_v8  ;;  %v4751_v7 = vld [vmem:[#allocation6] ss:$16 sps:$4 sm:$0xff]   ;;  %v4754_v8 = vld [vmem:[#allocation6 + $0x8] ss:$16 sps:$4 sm:$0xff]  }
  0x78   :  { %4328 = vmatmul.mubr.msk.bf16.vlgmr.msra.gmra.mrb[28].mxu0 %vm180_vm0, %v5275_v22  ;;  %4329 = vmatmul.mubr.msk.bf16.vlgmr.msra.gmra.mrb[28].mxu1 %vm180_vm0, %v5275_v22 }
  0x79   :  { %1001 = vmatpush1.bf16.msra.mxu0 %v4330_v13  ;;  %1042 = vmatpush1.bf16.msra.mxu1 %v4332_v14  ;;  %v4768_v13 = vld [vmem:[#allocation6 + $0x4c] ss:$16 sps:$4 sm:$0xff]   ;;  %v4763_v14 = vld [vmem:[#allocation6 + $0x40] ss:$16 sps:$4 sm:$0xff]  }
  0x7a   :  { %1032 = vmatprep.mubr.bf16.mxu0 %v5274_v0  ;;  %1073 = vmatprep.mubr.bf16.mxu1 %v5274_v0 }
  0x7b   :  { %1082 = vmatprep.subr.bf16.mxu0 %v4335_v15  ;;  %1123 = vmatprep.subr.bf16.mxu1 %v4337_v16  ;;  %v4771_v15 = vld [vmem:[#allocation6 + $0x64] ss:$16 sps:$4 sm:$0xff]   ;;  %v4774_v16 = vld [vmem:[#allocation6 + $0x6c] ss:$16 sps:$4 sm:$0xff]  }
  0x80   :  { %4338 = vmatmul.mubr.msk.bf16.vlgmr.msra.gmra.mrb[32].mxu0 %vm180_vm0, %v5275_v22  ;;  %4339 = vmatmul.mubr.msk.bf16.vlgmr.msra.gmra.mrb[32].mxu1 %vm180_vm0, %v5275_v22 }
  0x81   :  { %1083 = vmatpush1.bf16.msra.mxu0 %v4334_v21  ;;  %1124 = vmatpush1.bf16.msra.mxu1 %v4336_v23  ;;  %v4775_v21 = vld [vmem:[#allocation6 + $0x80] ss:$16 sps:$4 sm:$0xff]   ;;  %v4778_v23 = vld [vmem:[#allocation6 + $0x88] ss:$16 sps:$4 sm:$0xff]  }
  0x82   :  { %1114 = vmatprep.mubr.bf16.mxu0 %v5274_v0  ;;  %1155 = vmatprep.mubr.bf16.mxu1 %v5274_v0 }
  0x83   :  { %1204 = vmatprep.subr.bf16.mxu0 %v4343_v24  ;;  %1245 = vmatprep.subr.bf16.mxu1 %v4345_v25  ;;  %v4783_v24 = vld [vmem:[#allocation6 + $0xa4] ss:$16 sps:$4 sm:$0xff]   ;;  %v4786_v25 = vld [vmem:[#allocation6 + $0xac] ss:$16 sps:$4 sm:$0xff]  }
  0x88   :  { %4340 = vmatmul.mubr.msk.bf16.vlgmr.msra.gmra.mrb[36].mxu0 %vm180_vm0, %v5275_v22  ;;  %4341 = vmatmul.mubr.msk.bf16.vlgmr.msra.gmra.mrb[36].mxu1 %vm180_vm0, %v5275_v22 }
  0x89   :  { %1205 = vmatpush1.bf16.msra.mxu0 %v4342_v30  ;;  %1246 = vmatpush1.bf16.msra.mxu1 %v4344_v31  ;;  %v4787_v30 = vld [vmem:[#allocation6 + $0xc0] ss:$16 sps:$4 sm:$0xff]   ;;  %v4790_v31 = vld [vmem:[#allocation6 + $0xc8] ss:$16 sps:$4 sm:$0xff]  }
  0x8a   :  { %1236 = vmatprep.mubr.bf16.mxu0 %v5274_v0  ;;  %1277 = vmatprep.mubr.bf16.mxu1 %v5274_v0 }
  0x8b   :  { %1286 = vmatprep.subr.bf16.mxu0 %v4347_v32  ;;  %1327 = vmatprep.subr.bf16.mxu1 %v4349_v33  ;;  %v4795_v32 = vld [vmem:[#allocation6 + $0xe4] ss:$16 sps:$4 sm:$0xff]   ;;  %v4798_v33 = vld [vmem:[#allocation6 + $0xec] ss:$16 sps:$4 sm:$0xff]  }
  0x90   :  { %4350 = vmatmul.mubr.msk.bf16.vlgmr.msra.gmra.mrb[40].mxu0 %vm180_vm0, %v5275_v22  ;;  %4351 = vmatmul.mubr.msk.bf16.vlgmr.msra.gmra.mrb[40].mxu1 %vm180_vm0, %v5275_v22 }
  0x91   :  { %1287 = vmatpush1.bf16.msra.mxu0 %v4346_v38  ;;  %1328 = vmatpush1.bf16.msra.mxu1 %v4348_v39  ;;  %v4799_v38 = vld [vmem:[#allocation6 + $0x100] ss:$16 sps:$4 sm:$0xff]   ;;  %v4802_v39 = vld [vmem:[#allocation6 + $0x108] ss:$16 sps:$4 sm:$0xff]  }
  0x92   :  { %1318 = vmatprep.mubr.bf16.mxu0 %v5274_v0  ;;  %1359 = vmatprep.mubr.bf16.mxu1 %v5274_v0 }
  0x93   :  { %1408 = vmatprep.subr.bf16.mxu0 %v4355_v40  ;;  %1449 = vmatprep.subr.bf16.mxu1 %v4357_v41  ;;  %v4807_v40 = vld [vmem:[#allocation6 + $0x124] ss:$16 sps:$4 sm:$0xff]   ;;  %v4810_v41 = vld [vmem:[#allocation6 + $0x12c] ss:$16 sps:$4 sm:$0xff]  }
  0x98   :  { %4352 = vmatmul.mubr.msk.bf16.vlgmr.msra.gmra.mrb[44].mxu0 %vm180_vm0, %v5275_v22  ;;  %4353 = vmatmul.mubr.msk.bf16.vlgmr.msra.gmra.mrb[44].mxu1 %vm180_vm0, %v5275_v22 }
  0x99   :  { %1409 = vmatpush1.bf16.msra.mxu0 %v4354_v46  ;;  %1450 = vmatpush1.bf16.msra.mxu1 %v4356_v47  ;;  %v4811_v46 = vld [vmem:[#allocation6 + $0x140] ss:$16 sps:$4 sm:$0xff]   ;;  %v4814_v47 = vld [vmem:[#allocation6 + $0x148] ss:$16 sps:$4 sm:$0xff]  }
  0x9a   :  { %1440 = vmatprep.mubr.bf16.mxu0 %v5274_v0  ;;  %1481 = vmatprep.mubr.bf16.mxu1 %v5274_v0 }
  0x9b   :  { %1490 = vmatprep.subr.bf16.mxu0 %v4359_v48  ;;  %1531 = vmatprep.subr.bf16.mxu1 %v4361_v49  ;;  %v4819_v48 = vld [vmem:[#allocation6 + $0x164] ss:$16 sps:$4 sm:$0xff]   ;;  %v4822_v49 = vld [vmem:[#allocation6 + $0x16c] ss:$16 sps:$4 sm:$0xff]  }
  0xa0   :  { %4362 = vmatmul.mubr.msk.bf16.vlgmr.msra.gmra.mrb[48].mxu0 %vm180_vm0, %v5275_v22  ;;  %4363 = vmatmul.mubr.msk.bf16.vlgmr.msra.gmra.mrb[48].mxu1 %vm180_vm0, %v5275_v22 }
  0xa1   :  { %1491 = vmatpush1.bf16.msra.mxu0 %v4358_v54  ;;  %1532 = vmatpush1.bf16.msra.mxu1 %v4360_v55  ;;  %v4823_v54 = vld [vmem:[#allocation6 + $0x180] ss:$16 sps:$4 sm:$0xff]   ;;  %v4826_v55 = vld [vmem:[#allocation6 + $0x188] ss:$16 sps:$4 sm:$0xff]  }
  0xa2   :  { %1522 = vmatprep.mubr.bf16.mxu0 %v5274_v0  ;;  %1563 = vmatprep.mubr.bf16.mxu1 %v5274_v0 }
  0xa3   :  { %1612 = vmatprep.subr.bf16.mxu0 %v4367_v56  ;;  %1653 = vmatprep.subr.bf16.mxu1 %v4369_v57  ;;  %v4831_v56 = vld [vmem:[#allocation6 + $0x1a4] ss:$16 sps:$4 sm:$0xff]   ;;  %v4834_v57 = vld [vmem:[#allocation6 + $0x1ac] ss:$16 sps:$4 sm:$0xff]  }
  0xa8   :  { %4364 = vmatmul.mubr.msk.bf16.vlgmr.msra.gmra.mrb[52].mxu0 %vm180_vm0, %v5275_v22  ;;  %4365 = vmatmul.mubr.msk.bf16.vlgmr.msra.gmra.mrb[52].mxu1 %vm180_vm0, %v5275_v22 }
  0xa9   :  { %1613 = vmatpush1.bf16.msra.mxu0 %v4366_v62  ;;  %1654 = vmatpush1.bf16.msra.mxu1 %v4368_v63  ;;  %v4835_v62 = vld [vmem:[#allocation6 + $0x1c0] ss:$16 sps:$4 sm:$0xff]   ;;  %v4838_v63 = vld [vmem:[#allocation6 + $0x1c8] ss:$16 sps:$4 sm:$0xff]  }
  0xaa   :  { %1644 = vmatprep.mubr.bf16.mxu0 %v5274_v0  ;;  %1685 = vmatprep.mubr.bf16.mxu1 %v5274_v0 }
  0xab   :  { %1694 = vmatprep.subr.bf16.mxu0 %v4371_v1  ;;  %1735 = vmatprep.subr.bf16.mxu1 %v4373_v2  ;;  %v4843_v1 = vld [vmem:[#allocation6 + $0x1e4] ss:$16 sps:$4 sm:$0xff]   ;;  %v4846_v2 = vld [vmem:[#allocation6 + $0x1ec] ss:$16 sps:$4 sm:$0xff]  }
  0xb0   :  { %4374 = vmatmul.mubr.msk.bf16.vlgmr.msra.gmra.mrb[56].mxu0 %vm180_vm0, %v5275_v22  ;;  %4375 = vmatmul.mubr.msk.bf16.vlgmr.msra.gmra.mrb[56].mxu1 %vm180_vm0, %v5275_v22 }
  0xb1   :  { %1695 = vmatpush1.bf16.msra.mxu0 %v4370_v3  ;;  %1736 = vmatpush1.bf16.msra.mxu1 %v4372_v4  ;;  %v4841_v3 = vld [vmem:[#allocation6 + $0x1e0] ss:$16 sps:$4 sm:$0xff]   ;;  %v4844_v4 = vld [vmem:[#allocation6 + $0x1e8] ss:$16 sps:$4 sm:$0xff]  }
  0xb2   :  { %1726 = vmatprep.mubr.bf16.mxu0 %v5274_v0  ;;  %1767 = vmatprep.mubr.bf16.mxu1 %v5274_v0  ;;  %v4765_v0 = vld [vmem:[#allocation6 + $0x44] ss:$16 sps:$4 sm:$0xff]  }
  0xb3   :  { %3576 = vmatprep.subr.bf16.mxu0 %v4753_v5  ;;  %3740 = vmatprep.subr.bf16.mxu1 %v4756_v6  ;;  %v4849_v5 = vld [vmem:[#allocation6 + $0x204] ss:$16 sps:$4 sm:$0xff]   ;;  %v4852_v6 = vld [vmem:[#allocation6 + $0x20c] ss:$16 sps:$4 sm:$0xff]  }
  0xb8   :  { %4376 = vmatmul.mubr.msk.bf16.vlgmr.msra.gmra.mrb[60].mxu0 %vm180_vm0, %v5275_v22  ;;  %4377 = vmatmul.mubr.msk.bf16.vlgmr.msra.gmra.mrb[60].mxu1 %vm180_vm0, %v5275_v22  ;;  %v4766_v22 = vld [vmem:[#allocation6 + $0x48] ss:$16 sps:$4 sm:$0xff]  }
  0xb9   :  { %3577 = vmatpush1.bf16.msra.mxu0 %v4751_v7  ;;  %3741 = vmatpush1.bf16.msra.mxu1 %v4754_v8 }
  0xba   :  { %3578 = vmatprep.subr.bf16.mxu0 %v4759_v10  ;;  %3742 = vmatprep.subr.bf16.mxu1 %v4762_v12 }
  0xbd   :  { %3579 = vmatpush1.bf16.msra.mxu0 %v4757_v9  ;;  %3743 = vmatpush1.bf16.msra.mxu1 %v4760_v11 }
  0xbe   :  { %3580 = vmatprep.subr.bf16.mxu0 %v4765_v0  ;;  %3744 = vmatprep.subr.bf16.mxu1 %v4768_v13 }
  0xc1   :  { %3581 = vmatpush1.bf16.msra.mxu0 %v4763_v14  ;;  %3745 = vmatpush1.bf16.msra.mxu1 %v4766_v22 }
  0xc2   :  { %3582 = vmatprep.subr.bf16.mxu0 %v4771_v15  ;;  %3746 = vmatprep.subr.bf16.mxu1 %v4774_v16 }
  0xc5   :  { %3583 = vmatpush1.bf16.msra.mxu0 %v4769_v17  ;;  %3747 = vmatpush1.bf16.msra.mxu1 %v4772_v18 }
  0xc6   :  { %3584 = vmatprep.subr.bf16.mxu0 %v4777_v19  ;;  %3748 = vmatprep.subr.bf16.mxu1 %v4780_v20 }
  0xc9   :  { %3585 = vmatpush1.bf16.msra.mxu0 %v4775_v21  ;;  %3749 = vmatpush1.bf16.msra.mxu1 %v4778_v23 }
  0xca   :  { %3586 = vmatprep.subr.bf16.mxu0 %v4783_v24  ;;  %3750 = vmatprep.subr.bf16.mxu1 %v4786_v25 }
  0xcd   :  { %3587 = vmatpush1.bf16.msra.mxu0 %v4781_v26  ;;  %3751 = vmatpush1.bf16.msra.mxu1 %v4784_v27 }
  0xce   :  { %3588 = vmatprep.subr.bf16.mxu0 %v4789_v28  ;;  %3752 = vmatprep.subr.bf16.mxu1 %v4792_v29 }
  0xd1   :  { %3589 = vmatpush1.bf16.msra.mxu0 %v4787_v30  ;;  %3753 = vmatpush1.bf16.msra.mxu1 %v4790_v31 }
  0xd2   :  { %3590 = vmatprep.subr.bf16.mxu0 %v4795_v32  ;;  %3754 = vmatprep.subr.bf16.mxu1 %v4798_v33 }
  0xd5   :  { %3591 = vmatpush1.bf16.msra.mxu0 %v4793_v34  ;;  %3755 = vmatpush1.bf16.msra.mxu1 %v4796_v35 }
  0xd6   :  { %3592 = vmatprep.subr.bf16.mxu0 %v4801_v36  ;;  %3756 = vmatprep.subr.bf16.mxu1 %v4804_v37 }
  0xd9   :  { %3593 = vmatpush1.bf16.msra.mxu0 %v4799_v38  ;;  %3757 = vmatpush1.bf16.msra.mxu1 %v4802_v39 }
  0xda   :  { %3594 = vmatprep.subr.bf16.mxu0 %v4807_v40  ;;  %3758 = vmatprep.subr.bf16.mxu1 %v4810_v41 }
  0xdd   :  { %3595 = vmatpush1.bf16.msra.mxu0 %v4805_v42  ;;  %3759 = vmatpush1.bf16.msra.mxu1 %v4808_v43 }
  0xde   :  { %3596 = vmatprep.subr.bf16.mxu0 %v4813_v44  ;;  %3760 = vmatprep.subr.bf16.mxu1 %v4816_v45 }
  0xe1   :  { %3597 = vmatpush1.bf16.msra.mxu0 %v4811_v46  ;;  %3761 = vmatpush1.bf16.msra.mxu1 %v4814_v47 }
  0xe2   :  { %3598 = vmatprep.subr.bf16.mxu0 %v4819_v48  ;;  %3762 = vmatprep.subr.bf16.mxu1 %v4822_v49 }
  0xe5   :  { %3599 = vmatpush1.bf16.msra.mxu0 %v4817_v50  ;;  %3763 = vmatpush1.bf16.msra.mxu1 %v4820_v51 }
  0xe6   :  { %3600 = vmatprep.subr.bf16.mxu0 %v4825_v52  ;;  %3764 = vmatprep.subr.bf16.mxu1 %v4828_v53 }
  0xe9   :  { %3601 = vmatpush1.bf16.msra.mxu0 %v4823_v54  ;;  %3765 = vmatpush1.bf16.msra.mxu1 %v4826_v55 }
  0xea   :  { %3602 = vmatprep.subr.bf16.mxu0 %v4831_v56  ;;  %3766 = vmatprep.subr.bf16.mxu1 %v4834_v57 }
  0xed   :  { %3603 = vmatpush1.bf16.msra.mxu0 %v4829_v58  ;;  %3767 = vmatpush1.bf16.msra.mxu1 %v4832_v59 }
  0xee   :  { %3604 = vmatprep.subr.bf16.mxu0 %v4837_v60  ;;  %3768 = vmatprep.subr.bf16.mxu1 %v4840_v61 }
  0xf1   :  { %3605 = vmatpush1.bf16.msra.mxu0 %v4835_v62  ;;  %3769 = vmatpush1.bf16.msra.mxu1 %v4838_v63 }
  0xf2   :  { %3606 = vmatprep.subr.bf16.mxu0 %v4843_v1  ;;  %3770 = vmatprep.subr.bf16.mxu1 %v4846_v2 }
  0xf5   :  { %3607 = vmatpush1.bf16.msra.mxu0 %v4841_v3  ;;  %3771 = vmatpush1.bf16.msra.mxu1 %v4844_v4 }
  0xf6   :  { %3617 = vmatprep.subr.bf16.mxu0 %v4849_v5  ;;  %3781 = vmatprep.subr.bf16.mxu1 %v4852_v6 }
 0x113   :  { %v218_v7 = vpop.f32.mrb[0].mxu0  ;;  %v259_v9 = vpop.f32.mrb[0].mxu1 }
 0x114   :  { %v220_v8 = vpop.f32.mrb[1].mxu0  ;;  %v261_v11 = vpop.f32.mrb[1].mxu1 }
 0x115   :  { %v222_v10 = vpop.f32.mrb[2].mxu0  ;;  %v263_v0 = vpop.f32.mrb[2].mxu1 }
 0x116   :  { %v223_v12 = vpop.f32.mrb[3].mxu0  ;;  %v264_v13 = vpop.f32.mrb[3].mxu1 }
 0x11b   :  { %v300_v14 = vpop.f32.mrb[4].mxu0  ;;  %v341_v15 = vpop.f32.mrb[4].mxu1 }
 0x11c   :  { %v302_v22 = vpop.f32.mrb[5].mxu0  ;;  %v343_v17 = vpop.f32.mrb[5].mxu1 }
 0x11d   :  { %v304_v16 = vpop.f32.mrb[6].mxu0  ;;  %v345_v19 = vpop.f32.mrb[6].mxu1 }
 0x11e   :  { %v305_v18 = vpop.f32.mrb[7].mxu0  ;;  %v346_v20 = vpop.f32.mrb[7].mxu1 }
 0x123   :  { %v422_v21 = vpop.f32.mrb[8].mxu0  ;;  %v463_v25 = vpop.f32.mrb[8].mxu1 }
 0x124   :  { %v1848_v23 = vrot.slane %v422_v21, 7  ;;  %v424_v24 = vpop.f32.mrb[9].mxu0  ;;  %v1883_v28 = vrot.slane %v463_v25, 7  ;;  %v465_v29 = vpop.f32.mrb[9].mxu1 }
 0x125   :  { %v1869_v26 = vrot.slane %v424_v24, 7  ;;  %v426_v27 = vpop.f32.mrb[10].mxu0  ;;  %v1897_v32 = vrot.slane %v465_v29, 7  ;;  %v467_v33 = vpop.f32.mrb[10].mxu1 }
 0x126   :  { %v1850_v30 = vsel %vm1849_vm1, %v1848_v23, %v218_v7  ;;  %v427_v31 = vpop.f32.mrb[11].mxu0  ;;  %v1884_v35 = vsel %vm1849_vm1, %v1883_v28, %v259_v9  ;;  %v468_v36 = vpop.f32.mrb[11].mxu1 }
 0x127   :  { %v1870_v34 = vsel %vm1849_vm1, %v1869_v26, %v220_v8  ;;  %v1898_v37 = vsel %vm1849_vm1, %v1897_v32, %v261_v11 }
 0x12b   :  { %v504_v38 = vpop.f32.mrb[12].mxu0  ;;  %v545_v41 = vpop.f32.mrb[12].mxu1 }
 0x12c   :  { %v1911_v39 = vrot.slane %v504_v38, 7  ;;  %v506_v40 = vpop.f32.mrb[13].mxu0  ;;  %v1939_v44 = vrot.slane %v545_v41, 7  ;;  %v547_v45 = vpop.f32.mrb[13].mxu1 }
 0x12d   :  { %v1925_v42 = vrot.slane %v506_v40, 7  ;;  %v508_v43 = vpop.f32.mrb[14].mxu0  ;;  %v1953_v48 = vrot.slane %v547_v45, 7  ;;  %v549_v49 = vpop.f32.mrb[14].mxu1 }
 0x12e   :  { %v1912_v46 = vsel %vm1849_vm1, %v1911_v39, %v300_v14  ;;  %v509_v47 = vpop.f32.mrb[15].mxu0  ;;  %v1940_v51 = vsel %vm1849_vm1, %v1939_v44, %v341_v15  ;;  %v550_v52 = vpop.f32.mrb[15].mxu1 }
 0x12f   :  { %v1926_v50 = vsel %vm1849_vm1, %v1925_v42, %v302_v22  ;;  %v1954_v53 = vsel %vm1849_vm1, %v1953_v48, %v343_v17 }
 0x133   :  { %v626_v54 = vpop.f32.mrb[16].mxu0  ;;  %v667_v57 = vpop.f32.mrb[16].mxu1 }
 0x134   :  { %v1851_v55 = vrot.slane %v626_v54, 6  ;;  %v628_v56 = vpop.f32.mrb[17].mxu0  ;;  %v1885_v60 = vrot.slane %v667_v57, 6  ;;  %v669_v61 = vpop.f32.mrb[17].mxu1 }
 0x135   :  { %v1871_v58 = vrot.slane %v628_v56, 6  ;;  %v630_v59 = vpop.f32.mrb[18].mxu0  ;;  %v1899_v1 = vrot.slane %v669_v61, 6  ;;  %v671_v2 = vpop.f32.mrb[18].mxu1 }
 0x136   :  { %v1853_v62 = vsel %vm1852_vm2, %v1851_v55, %v1850_v30  ;;  %v631_v63 = vpop.f32.mrb[19].mxu0  ;;  %v1886_v4 = vsel %vm1852_vm2, %v1885_v60, %v1884_v35  ;;  %v672_v5 = vpop.f32.mrb[19].mxu1 }
 0x137   :  { %v1872_v3 = vsel %vm1852_vm2, %v1871_v58, %v1870_v34  ;;  %v1900_v6 = vsel %vm1852_vm2, %v1899_v1, %v1898_v37 }
 0x13b   :  { %v708_v7 = vpop.f32.mrb[20].mxu0  ;;  %v749_v10 = vpop.f32.mrb[20].mxu1 }
 0x13c   :  { %v1913_v8 = vrot.slane %v708_v7, 6  ;;  %v710_v9 = vpop.f32.mrb[21].mxu0  ;;  %v1941_v0 = vrot.slane %v749_v10, 6  ;;  %v751_v13 = vpop.f32.mrb[21].mxu1 }
 0x13d   :  { %v1927_v11 = vrot.slane %v710_v9, 6  ;;  %v712_v12 = vpop.f32.mrb[22].mxu0  ;;  %v1955_v15 = vrot.slane %v751_v13, 6  ;;  %v753_v16 = vpop.f32.mrb[22].mxu1 }
 0x13e   :  { %v1914_v14 = vsel %vm1852_vm2, %v1913_v8, %v1912_v46  ;;  %v713_v22 = vpop.f32.mrb[23].mxu0  ;;  %v1942_v18 = vsel %vm1852_vm2, %v1941_v0, %v1940_v51  ;;  %v754_v19 = vpop.f32.mrb[23].mxu1 }
 0x13f   :  { %v1928_v17 = vsel %vm1852_vm2, %v1927_v11, %v1926_v50  ;;  %v1956_v20 = vsel %vm1852_vm2, %v1955_v15, %v1954_v53 }
 0x143   :  { %v830_v21 = vpop.f32.mrb[24].mxu0  ;;  %v871_v25 = vpop.f32.mrb[24].mxu1 }
 0x144   :  { %v1854_v23 = vrot.slane %v830_v21, 5  ;;  %v832_v24 = vpop.f32.mrb[25].mxu0  ;;  %v1887_v28 = vrot.slane %v871_v25, 5  ;;  %v873_v29 = vpop.f32.mrb[25].mxu1 }
 0x145   :  { %v1873_v26 = vrot.slane %v832_v24, 5  ;;  %v834_v27 = vpop.f32.mrb[26].mxu0  ;;  %v1901_v32 = vrot.slane %v873_v29, 5  ;;  %v875_v33 = vpop.f32.mrb[26].mxu1 }
 0x146   :  { %v1856_v30 = vsel %vm1855_vm3, %v1854_v23, %v1853_v62  ;;  %v835_v31 = vpop.f32.mrb[27].mxu0  ;;  %v1888_v35 = vsel %vm1855_vm3, %v1887_v28, %v1886_v4  ;;  %v876_v36 = vpop.f32.mrb[27].mxu1 }
 0x147   :  { %v1874_v34 = vsel %vm1855_vm3, %v1873_v26, %v1872_v3  ;;  %v1902_v37 = vsel %vm1855_vm3, %v1901_v32, %v1900_v6 }
 0x14b   :  { %v912_v38 = vpop.f32.mrb[28].mxu0  ;;  %v953_v41 = vpop.f32.mrb[28].mxu1 }
 0x14c   :  { %v1915_v39 = vrot.slane %v912_v38, 5  ;;  %v914_v40 = vpop.f32.mrb[29].mxu0  ;;  %v1943_v44 = vrot.slane %v953_v41, 5  ;;  %v955_v45 = vpop.f32.mrb[29].mxu1 }
 0x14d   :  { %v1929_v42 = vrot.slane %v914_v40, 5  ;;  %v916_v43 = vpop.f32.mrb[30].mxu0  ;;  %v1957_v48 = vrot.slane %v955_v45, 5  ;;  %v957_v49 = vpop.f32.mrb[30].mxu1 }
 0x14e   :  { %v1916_v46 = vsel %vm1855_vm3, %v1915_v39, %v1914_v14  ;;  %v917_v47 = vpop.f32.mrb[31].mxu0  ;;  %v1944_v51 = vsel %vm1855_vm3, %v1943_v44, %v1942_v18  ;;  %v958_v52 = vpop.f32.mrb[31].mxu1 }
 0x14f   :  { %v1930_v50 = vsel %vm1855_vm3, %v1929_v42, %v1928_v17  ;;  %v1958_v53 = vsel %vm1855_vm3, %v1957_v48, %v1956_v20 }
 0x153   :  { %v1034_v54 = vpop.f32.mrb[32].mxu0  ;;  %v1075_v57 = vpop.f32.mrb[32].mxu1 }
 0x154   :  { %v1857_v55 = vrot.slane %v1034_v54, 4  ;;  %v1036_v56 = vpop.f32.mrb[33].mxu0  ;;  %v1889_v59 = vrot.slane %v1075_v57, 4  ;;  %v1077_v61 = vpop.f32.mrb[33].mxu1 }
 0x155   :  { %v1875_v58 = vrot.slane %v1036_v56, 4  ;;  %v1038_v60 = vpop.f32.mrb[34].mxu0  ;;  %v1903_v63 = vrot.slane %v1077_v61, 4  ;;  %v1079_v2 = vpop.f32.mrb[34].mxu1 }
 0x156   :  { %v1859_v62 = vsel %vm1858_vm4, %v1857_v55, %v1856_v30  ;;  %v1039_v1 = vpop.f32.mrb[35].mxu0  ;;  %v1890_v4 = vsel %vm1858_vm4, %v1889_v59, %v1888_v35  ;;  %v1080_v5 = vpop.f32.mrb[35].mxu1 }
 0x157   :  { %v1876_v3 = vsel %vm1858_vm4, %v1875_v58, %v1874_v34  ;;  %v1904_v6 = vsel %vm1858_vm4, %v1903_v63, %v1902_v37 }
 0x15b   :  { %v1116_v7 = vpop.f32.mrb[36].mxu0  ;;  %v1157_v10 = vpop.f32.mrb[36].mxu1 }
 0x15c   :  { %v1917_v8 = vrot.slane %v1116_v7, 4  ;;  %v1118_v9 = vpop.f32.mrb[37].mxu0  ;;  %v1945_v12 = vrot.slane %v1157_v10, 4  ;;  %v1159_v13 = vpop.f32.mrb[37].mxu1 }
 0x15d   :  { %v1931_v11 = vrot.slane %v1118_v9, 4  ;;  %v1120_v0 = vpop.f32.mrb[38].mxu0  ;;  %v1959_v22 = vrot.slane %v1159_v13, 4  ;;  %v1161_v16 = vpop.f32.mrb[38].mxu1 }
 0x15e   :  { %v1918_v14 = vsel %vm1858_vm4, %v1917_v8, %v1916_v46  ;;  %v1121_v15 = vpop.f32.mrb[39].mxu0  ;;  %v1946_v18 = vsel %vm1858_vm4, %v1945_v12, %v1944_v51  ;;  %v1162_v19 = vpop.f32.mrb[39].mxu1 }
 0x15f   :  { %v1932_v17 = vsel %vm1858_vm4, %v1931_v11, %v1930_v50  ;;  %v1960_v20 = vsel %vm1858_vm4, %v1959_v22, %v1958_v53 }
 0x163   :  { %v1238_v21 = vpop.f32.mrb[40].mxu0  ;;  %v1279_v24 = vpop.f32.mrb[40].mxu1 }
 0x164   :  { %v1860_v23 = vrot.slane %v1238_v21, 3  ;;  %v1240_v25 = vpop.f32.mrb[41].mxu0  ;;  %v1891_v26 = vrot.slane %v1279_v24, 3  ;;  %v1281_v28 = vpop.f32.mrb[41].mxu1 }
 0x165   :  { %v1877_v27 = vrot.slane %v1240_v25, 3  ;;  %v1242_v29 = vpop.f32.mrb[42].mxu0  ;;  %v1905_v31 = vrot.slane %v1281_v28, 3  ;;  %v1283_v33 = vpop.f32.mrb[42].mxu1 }
 0x166   :  { %v1862_v30 = vsel %vm1861_vm5, %v1860_v23, %v1859_v62  ;;  %v1243_v32 = vpop.f32.mrb[43].mxu0  ;;  %v1892_v34 = vsel %vm1861_vm5, %v1891_v26, %v1890_v4  ;;  %v1284_v36 = vpop.f32.mrb[43].mxu1 }
 0x167   :  { %v1878_v35 = vsel %vm1861_vm5, %v1877_v27, %v1876_v3  ;;  %v1906_v37 = vsel %vm1861_vm5, %v1905_v31, %v1904_v6 }
 0x16b   :  { %v1320_v38 = vpop.f32.mrb[44].mxu0  ;;  %v1361_v40 = vpop.f32.mrb[44].mxu1 }
 0x16c   :  { %v1919_v39 = vrot.slane %v1320_v38, 3  ;;  %v1322_v41 = vpop.f32.mrb[45].mxu0  ;;  %v1947_v42 = vrot.slane %v1361_v40, 3  ;;  %v1363_v44 = vpop.f32.mrb[45].mxu1 }
 0x16d   :  { %v1933_v43 = vrot.slane %v1322_v41, 3  ;;  %v1324_v45 = vpop.f32.mrb[46].mxu0  ;;  %v1961_v47 = vrot.slane %v1363_v44, 3  ;;  %v1365_v49 = vpop.f32.mrb[46].mxu1 }
 0x16e   :  { %v1920_v46 = vsel %vm1861_vm5, %v1919_v39, %v1918_v14  ;;  %v1325_v48 = vpop.f32.mrb[47].mxu0  ;;  %v1948_v50 = vsel %vm1861_vm5, %v1947_v42, %v1946_v18  ;;  %v1366_v52 = vpop.f32.mrb[47].mxu1  ;;  %v4847_v42 = vld [vmem:[#allocation6 + $0x200] ss:$16 sps:$4 sm:$0xff]  }
 0x16f   :  { %v1934_v51 = vsel %vm1861_vm5, %v1933_v43, %v1932_v17  ;;  %v1962_v53 = vsel %vm1861_vm5, %v1961_v47, %v1960_v20  ;;  %v4850_v43 = vld [vmem:[#allocation6 + $0x208] ss:$16 sps:$4 sm:$0xff]  }
 0x173   :  { %v1442_v54 = vpop.f32.mrb[48].mxu0  ;;  %v1483_v56 = vpop.f32.mrb[48].mxu1 }
 0x174   :  { %v1863_v55 = vrot.slane %v1442_v54, 2  ;;  %v1444_v57 = vpop.f32.mrb[49].mxu0  ;;  %v1893_v58 = vrot.slane %v1483_v56, 2  ;;  %v1485_v60 = vpop.f32.mrb[49].mxu1 }
 0x175   :  { %v1879_v59 = vrot.slane %v1444_v57, 2  ;;  %v1446_v61 = vpop.f32.mrb[50].mxu0  ;;  %v1907_v63 = vrot.slane %v1485_v60, 2  ;;  %v1487_v2 = vpop.f32.mrb[50].mxu1 }
 0x176   :  { %v1865_v62 = vsel %vm1864_vm6, %v1863_v55, %v1862_v30  ;;  %v1447_v1 = vpop.f32.mrb[51].mxu0  ;;  %v1894_v3 = vsel %vm1864_vm6, %v1893_v58, %v1892_v34  ;;  %v1488_v5 = vpop.f32.mrb[51].mxu1  ;;  %v4853_v58 = vld [vmem:[#allocation6 + $0x220] ss:$16 sps:$4 sm:$0xff]  }
 0x177   :  { %v1880_v4 = vsel %vm1864_vm6, %v1879_v59, %v1878_v35  ;;  %v1908_v6 = vsel %vm1864_vm6, %v1907_v63, %v1906_v37  ;;  %v4856_v59 = vld [vmem:[#allocation6 + $0x228] ss:$16 sps:$4 sm:$0xff]   ;;  %v4864_v63 = vld [vmem:[#allocation6 + $0x24c] ss:$16 sps:$4 sm:$0xff]   ;;  %v4859_v5 = vld [vmem:[#allocation6 + $0x240] ss:$16 sps:$4 sm:$0xff]  }
 0x17b   :  { %v1524_v7 = vpop.f32.mrb[52].mxu0  ;;  %v1565_v9 = vpop.f32.mrb[52].mxu1 }
 0x17c   :  { %v1921_v8 = vrot.slane %v1524_v7, 2  ;;  %v1526_v10 = vpop.f32.mrb[53].mxu0  ;;  %v1949_v11 = vrot.slane %v1565_v9, 2  ;;  %v1567_v0 = vpop.f32.mrb[53].mxu1  ;;  %v4867_v7 = vld [vmem:[#allocation6 + $0x264] ss:$16 sps:$4 sm:$0xff]  }
 0x17d   :  { %v1935_v12 = vrot.slane %v1526_v10, 2  ;;  %v1528_v13 = vpop.f32.mrb[54].mxu0  ;;  %v1963_v22 = vrot.slane %v1567_v0, 2  ;;  %v1569_v16 = vpop.f32.mrb[54].mxu1  ;;  %v4865_v9 = vld [vmem:[#allocation6 + $0x260] ss:$16 sps:$4 sm:$0xff]  }
 0x17e   :  { %v1922_v14 = vsel %vm1864_vm6, %v1921_v8, %v1920_v46  ;;  %v1529_v15 = vpop.f32.mrb[55].mxu0  ;;  %v1950_v17 = vsel %vm1864_vm6, %v1949_v11, %v1948_v50  ;;  %v1570_v19 = vpop.f32.mrb[55].mxu1  ;;  %v4855_v46 = vld [vmem:[#allocation6 + $0x224] ss:$16 sps:$4 sm:$0xff]   ;;  %v4858_v50 = vld [vmem:[#allocation6 + $0x22c] ss:$16 sps:$4 sm:$0xff]  }
 0x17f   :  { %v1936_v18 = vsel %vm1864_vm6, %v1935_v12, %v1934_v51  ;;  %v1964_v20 = vsel %vm1864_vm6, %v1963_v22, %v1962_v53  ;;  %v4870_v8 = vld [vmem:[#allocation6 + $0x26c] ss:$16 sps:$4 sm:$0xff]   ;;  %v4868_v10 = vld [vmem:[#allocation6 + $0x268] ss:$16 sps:$4 sm:$0xff]   ;;  %v4873_v11 = vld [vmem:[#allocation6 + $0x284] ss:$16 sps:$4 sm:$0xff]  }
 0x180   :  { %v4876_v12 = vld [vmem:[#allocation6 + $0x28c] ss:$16 sps:$4 sm:$0xff]   ;;  %v4871_v0 = vld [vmem:[#allocation6 + $0x280] ss:$16 sps:$4 sm:$0xff]   ;;  %v4874_v13 = vld [vmem:[#allocation6 + $0x288] ss:$16 sps:$4 sm:$0xff]  }
 0x181   :  { %v4882_v22 = vld [vmem:[#allocation6 + $0x2ac] ss:$16 sps:$4 sm:$0xff]   ;;  %v4877_v15 = vld [vmem:[#allocation6 + $0x2a0] ss:$16 sps:$4 sm:$0xff]   ;;  %v4880_v16 = vld [vmem:[#allocation6 + $0x2a8] ss:$16 sps:$4 sm:$0xff]  }
 0x182   :  { %v4883_v19 = vld [vmem:[#allocation6 + $0x2c0] ss:$16 sps:$4 sm:$0xff]  }
 0x183   :  { %v1646_v21 = vpop.f32.mrb[56].mxu0  ;;  %v1687_v24 = vpop.f32.mrb[56].mxu1 }
 0x184   :  { %v1866_v23 = vrot.slane %v1646_v21, 1  ;;  %v1648_v25 = vpop.f32.mrb[57].mxu0  ;;  %v1895_v26 = vrot.slane %v1687_v24, 1  ;;  %v1689_v28 = vpop.f32.mrb[57].mxu1  ;;  %v4891_v21 = vld [vmem:[#allocation6 + $0x2e4] ss:$16 sps:$4 sm:$0xff]  }
 0x185   :  { %v1881_v27 = vrot.slane %v1648_v25, 1  ;;  %v1650_v29 = vpop.f32.mrb[58].mxu0  ;;  %v1909_v31 = vrot.slane %v1689_v28, 1  ;;  %v1691_v33 = vpop.f32.mrb[58].mxu1  ;;  %v4889_v24 = vld [vmem:[#allocation6 + $0x2e0] ss:$16 sps:$4 sm:$0xff]  }
 0x186   :  { %v1868_v30 = vsel %vm1867_vm7, %v1866_v23, %v1865_v62  ;;  %v1651_v32 = vpop.f32.mrb[59].mxu0  ;;  %v5489_v35 = vsel %vm1867_vm7, %v1895_v26, %v1894_v3  ;;  %v1692_v36 = vpop.f32.mrb[59].mxu1  ;;  %v4861_v62 = vld [vmem:[#allocation6 + $0x244] ss:$16 sps:$4 sm:$0xff]   ;;  %v4894_v23 = vld [vmem:[#allocation6 + $0x2ec] ss:$16 sps:$4 sm:$0xff]  }
 0x187   :  { %v2002_v34 = vmul.f32 0.125, %v1868_v30  ;;  %v1882_v37 = vsel %vm1867_vm7, %v1881_v27, %v1880_v4  ;;  %v1910_v39 = vsel %vm1867_vm7, %v1909_v31, %v1908_v6  ;;  %v4862_v6 = vld [vmem:[#allocation6 + $0x248] ss:$16 sps:$4 sm:$0xff]   ;;  %v4897_v26 = vld [vmem:[#allocation6 + $0x304] ss:$16 sps:$4 sm:$0xff]  }
 0x188   :  { %v2003_v38 = vmul.f32 0.125, %v1882_v37  ;;  %v2005_v40 = vmul.f32 0.125, %v1910_v39  ;;  %v4892_v25 = vld [vmem:[#allocation6 + $0x2e8] ss:$16 sps:$4 sm:$0xff]   ;;  %v4900_v27 = vld [vmem:[#allocation6 + $0x30c] ss:$16 sps:$4 sm:$0xff]  }
 0x189   :  { %v2010_v44 = vpack.c.bf16 %v2002_v34, %v2002_v34  ;;  %v4895_v28 = vld [vmem:[#allocation6 + $0x300] ss:$16 sps:$4 sm:$0xff]   ;;  %v4898_v29 = vld [vmem:[#allocation6 + $0x308] ss:$16 sps:$4 sm:$0xff]   ;;  %v4903_v30 = vld [vmem:[#allocation6 + $0x324] ss:$16 sps:$4 sm:$0xff]  }
 0x18a   :  { %v2011_v41 = vpack.c.bf16 %v2003_v38, %v2003_v38  ;;  %v2013_v54 = vpack.c.bf16 %v2005_v40, %v2005_v40  ;;  %v4906_v31 = vld [vmem:[#allocation6 + $0x32c] ss:$16 sps:$4 sm:$0xff]   ;;  %v4901_v32 = vld [vmem:[#allocation6 + $0x320] ss:$16 sps:$4 sm:$0xff]   ;;  %v4904_v33 = vld [vmem:[#allocation6 + $0x328] ss:$16 sps:$4 sm:$0xff]  }
 0x18b   :  { %v1728_v45 = vpop.f32.mrb[60].mxu0  ;;  %v1769_v48 = vpop.f32.mrb[60].mxu1  ;;  %v4909_v34 = vld [vmem:[#allocation6 + $0x344] ss:$16 sps:$4 sm:$0xff]   ;;  %v4912_v36 = vld [vmem:[#allocation6 + $0x34c] ss:$16 sps:$4 sm:$0xff]  }
 0x18c   :  { %v1923_v47 = vrot.slane %v1728_v45, 1  ;;  %v1730_v49 = vpop.f32.mrb[61].mxu0  ;;  %3608 = vmatprep.mubr.bf16.mxu0 %v2011_v41  ;;  %3772 = vmatprep.mubr.bf16.mxu1 %v2011_v41  ;;  %v1951_v51 = vrot.slane %v1769_v48, 1  ;;  %v1771_v53 = vpop.f32.mrb[61].mxu1  ;;  %v4907_v37 = vld [vmem:[#allocation6 + $0x340] ss:$16 sps:$4 sm:$0xff]  }
 0x18d   :  { %v1937_v52 = vrot.slane %v1730_v49, 1  ;;  %3609 = vmatmul.mubr.bf16.vlgmr.msra.gmra.mrb[64].mxu0 %v2010_v44  ;;  %3773 = vmatmul.mubr.bf16.vlgmr.msra.gmra.mrb[64].mxu1 %v2010_v44  ;;  %v1732_v55 = vpop.f32.mrb[62].mxu0  ;;  %v1965_v57 = vrot.slane %v1771_v53, 1  ;;  %v1773_v2 = vpop.f32.mrb[62].mxu1  ;;  %v4910_v38 = vld [vmem:[#allocation6 + $0x348] ss:$16 sps:$4 sm:$0xff]  }
 0x18e   :  { %v5494_v56 = vsel %vm1867_vm7, %v1923_v47, %v1922_v14  ;;  %3618 = vmatpush1.bf16.msra.mxu0 %v4847_v42  ;;  %3782 = vmatpush1.bf16.msra.mxu1 %v4850_v43  ;;  %v1733_v60 = vpop.f32.mrb[63].mxu0  ;;  %v5497_v61 = vsel %vm1867_vm7, %v1951_v51, %v1950_v17  ;;  %v1774_v4 = vpop.f32.mrb[63].mxu1  ;;  %v4879_v14 = vld [vmem:[#allocation6 + $0x2a4] ss:$16 sps:$4 sm:$0xff]   ;;  %v4918_v40 = vld [vmem:[#allocation6 + $0x36c] ss:$16 sps:$4 sm:$0xff]  }
 0x18f   :  { %3649 = vmatprep.mubr.bf16.mxu0 %v2013_v54  ;;  %3813 = vmatprep.mubr.bf16.mxu1 %v2013_v54  ;;  %v5500_v1 = vsel %vm1867_vm7, %v1937_v52, %v1936_v18  ;;  %v5503_v3 = vsel %vm1867_vm7, %v1965_v57, %v1964_v20  ;;  %v4885_v17 = vld [vmem:[#allocation6 + $0x2c4] ss:$16 sps:$4 sm:$0xff]   ;;  %v4888_v18 = vld [vmem:[#allocation6 + $0x2cc] ss:$16 sps:$4 sm:$0xff]   ;;  %v4886_v20 = vld [vmem:[#allocation6 + $0x2c8] ss:$16 sps:$4 sm:$0xff]  }
 0x190   :  { %3619 = vmatprep.subr.bf16.mxu0 %v4855_v46  ;;  %3783 = vmatprep.subr.bf16.mxu1 %v4858_v50  ;;  %v4915_v39 = vld [vmem:[#allocation6 + $0x364] ss:$16 sps:$4 sm:$0xff]   ;;  %v4913_v41 = vld [vmem:[#allocation6 + $0x360] ss:$16 sps:$4 sm:$0xff]   ;;  %v4916_v42 = vld [vmem:[#allocation6 + $0x368] ss:$16 sps:$4 sm:$0xff]  }
 0x191   :  { %v4921_v43 = vld [vmem:[#allocation6 + $0x384] ss:$16 sps:$4 sm:$0xff]   ;;  %v4924_v44 = vld [vmem:[#allocation6 + $0x38c] ss:$16 sps:$4 sm:$0xff]   ;;  %v4919_v45 = vld [vmem:[#allocation6 + $0x380] ss:$16 sps:$4 sm:$0xff]  }
 0x192   :  { %3620 = vmatpush1.bf16.msra.mxu0 %v4853_v58  ;;  %3784 = vmatpush1.bf16.msra.mxu1 %v4856_v59  ;;  %v4922_v46 = vld [vmem:[#allocation6 + $0x388] ss:$16 sps:$4 sm:$0xff]   ;;  %v4927_v47 = vld [vmem:[#allocation6 + $0x3a4] ss:$16 sps:$4 sm:$0xff]   ;;  %v4930_v48 = vld [vmem:[#allocation6 + $0x3ac] ss:$16 sps:$4 sm:$0xff]  }
 0x193   :  { %3621 = vmatprep.subr.bf16.mxu0 %v4861_v62  ;;  %3785 = vmatprep.subr.bf16.mxu1 %v4864_v63  ;;  %v4925_v49 = vld [vmem:[#allocation6 + $0x3a0] ss:$16 sps:$4 sm:$0xff]   ;;  %v4928_v50 = vld [vmem:[#allocation6 + $0x3a8] ss:$16 sps:$4 sm:$0xff]   ;;  %v4933_v51 = vld [vmem:[#allocation6 + $0x3c4] ss:$16 sps:$4 sm:$0xff]  }
 0x194   :  { %v4936_v52 = vld [vmem:[#allocation6 + $0x3cc] ss:$16 sps:$4 sm:$0xff]   ;;  %v4931_v53 = vld [vmem:[#allocation6 + $0x3c0] ss:$16 sps:$4 sm:$0xff]   ;;  %v4934_v54 = vld [vmem:[#allocation6 + $0x3c8] ss:$16 sps:$4 sm:$0xff]  }
 0x195   :  { %v4939_v55 = vld [vmem:[#allocation6 + $0x3e4] ss:$16 sps:$4 sm:$0xff]   ;;  %v4942_v57 = vld [vmem:[#allocation6 + $0x3ec] ss:$16 sps:$4 sm:$0xff]   ;;  %v4937_v58 = vld [vmem:[#allocation6 + $0x3e0] ss:$16 sps:$4 sm:$0xff]  }
 0x196   :  { %3622 = vmatpush1.bf16.msra.mxu0 %v4859_v5  ;;  %3786 = vmatpush1.bf16.msra.mxu1 %v4862_v6  ;;  %v4940_v59 = vld [vmem:[#allocation6 + $0x3e8] ss:$16 sps:$4 sm:$0xff]   ;;  %v2004_v60 = vmul.f32 0.125, %v5489_v35  ;;  %v4945_v62 = vld [vmem:[#allocation6 + $0x404] ss:$16 sps:$4 sm:$0xff]   ;;  %v2007_v2 = vmul.f32 0.125, %v5500_v1 }
 0x197   :  { %3623 = vmatprep.subr.bf16.mxu0 %v4867_v7  ;;  %3787 = vmatprep.subr.bf16.mxu1 %v4870_v8  ;;  %v4948_v63 = vld [vmem:[#allocation6 + $0x40c] ss:$16 sps:$4 sm:$0xff]   ;;  %v4943_v4 = vld [vmem:[#allocation6 + $0x400] ss:$16 sps:$4 sm:$0xff]   ;;  %v4946_v6 = vld [vmem:[#allocation6 + $0x408] ss:$16 sps:$4 sm:$0xff]  }
 0x198   :  { %v2012_v5 = vpack.c.bf16 %v2004_v60, %v2004_v60  ;;  %v2015_v7 = vpack.c.bf16 %v2007_v2, %v2007_v2  ;;  %v4951_v8 = vld [vmem:[#allocation6 + $0x424] ss:$16 sps:$4 sm:$0xff]   ;;  %v4949_v35 = vld [vmem:[#allocation6 + $0x420] ss:$16 sps:$4 sm:$0xff]   ;;  %v4960_v1 = vld [vmem:[#allocation6 + $0x44c] ss:$16 sps:$4 sm:$0xff]  }
 0x199   :  { %v5032_v60 = vld [vmem:[#allocation6 + $0x5cc] ss:$16 sps:$4 sm:$0xff]   ;;  %v5035_v2 = vld [vmem:[#allocation6 + $0x5e4] ss:$16 sps:$4 sm:$0xff]  }
 0x19a   :  { %3624 = vmatpush1.bf16.msra.mxu0 %v4865_v9  ;;  %3788 = vmatpush1.bf16.msra.mxu1 %v4868_v10  ;;  %v4954_v9 = vld [vmem:[#allocation6 + $0x42c] ss:$16 sps:$4 sm:$0xff]   ;;  %v4952_v10 = vld [vmem:[#allocation6 + $0x428] ss:$16 sps:$4 sm:$0xff]  }
 0x19b   :  { %3625 = vmatprep.subr.bf16.mxu0 %v4873_v11  ;;  %3789 = vmatprep.subr.bf16.mxu1 %v4876_v12  ;;  %v4957_v11 = vld [vmem:[#allocation6 + $0x444] ss:$16 sps:$4 sm:$0xff]   ;;  %v4955_v12 = vld [vmem:[#allocation6 + $0x440] ss:$16 sps:$4 sm:$0xff]  }
 0x19e   :  { %3626 = vmatpush1.bf16.msra.mxu0 %v4871_v0  ;;  %3790 = vmatpush1.bf16.msra.mxu1 %v4874_v13  ;;  %v4958_v0 = vld [vmem:[#allocation6 + $0x448] ss:$16 sps:$4 sm:$0xff]   ;;  %v4963_v13 = vld [vmem:[#allocation6 + $0x464] ss:$16 sps:$4 sm:$0xff]  }
 0x19f   :  { %3627 = vmatprep.subr.bf16.mxu0 %v4879_v14  ;;  %3791 = vmatprep.subr.bf16.mxu1 %v4882_v22  ;;  %v4966_v14 = vld [vmem:[#allocation6 + $0x46c] ss:$16 sps:$4 sm:$0xff]   ;;  %v4961_v22 = vld [vmem:[#allocation6 + $0x460] ss:$16 sps:$4 sm:$0xff]  }
 0x1a2   :  { %3628 = vmatpush1.bf16.msra.mxu0 %v4877_v15  ;;  %3792 = vmatpush1.bf16.msra.mxu1 %v4880_v16  ;;  %v4964_v15 = vld [vmem:[#allocation6 + $0x468] ss:$16 sps:$4 sm:$0xff]   ;;  %v4969_v16 = vld [vmem:[#allocation6 + $0x484] ss:$16 sps:$4 sm:$0xff]  }
 0x1a3   :  { %3629 = vmatprep.subr.bf16.mxu0 %v4885_v17  ;;  %3793 = vmatprep.subr.bf16.mxu1 %v4888_v18  ;;  %v4972_v17 = vld [vmem:[#allocation6 + $0x48c] ss:$16 sps:$4 sm:$0xff]   ;;  %v4967_v18 = vld [vmem:[#allocation6 + $0x480] ss:$16 sps:$4 sm:$0xff]  }
 0x1a6   :  { %3630 = vmatpush1.bf16.msra.mxu0 %v4883_v19  ;;  %3794 = vmatpush1.bf16.msra.mxu1 %v4886_v20  ;;  %v4970_v19 = vld [vmem:[#allocation6 + $0x488] ss:$16 sps:$4 sm:$0xff]   ;;  %v4975_v20 = vld [vmem:[#allocation6 + $0x4a4] ss:$16 sps:$4 sm:$0xff]  }
 0x1a7   :  { %3631 = vmatprep.subr.bf16.mxu0 %v4891_v21  ;;  %3795 = vmatprep.subr.bf16.mxu1 %v4894_v23  ;;  %v4978_v21 = vld [vmem:[#allocation6 + $0x4ac] ss:$16 sps:$4 sm:$0xff]   ;;  %v4973_v23 = vld [vmem:[#allocation6 + $0x4a0] ss:$16 sps:$4 sm:$0xff]  }
 0x1aa   :  { %3632 = vmatpush1.bf16.msra.mxu0 %v4889_v24  ;;  %3796 = vmatpush1.bf16.msra.mxu1 %v4892_v25  ;;  %v4976_v24 = vld [vmem:[#allocation6 + $0x4a8] ss:$16 sps:$4 sm:$0xff]   ;;  %v4981_v25 = vld [vmem:[#allocation6 + $0x4c4] ss:$16 sps:$4 sm:$0xff]  }
 0x1ab   :  { %3633 = vmatprep.subr.bf16.mxu0 %v4897_v26  ;;  %3797 = vmatprep.subr.bf16.mxu1 %v4900_v27  ;;  %v4984_v26 = vld [vmem:[#allocation6 + $0x4cc] ss:$16 sps:$4 sm:$0xff]   ;;  %v4979_v27 = vld [vmem:[#allocation6 + $0x4c0] ss:$16 sps:$4 sm:$0xff]  }
 0x1ae   :  { %3634 = vmatpush1.bf16.msra.mxu0 %v4895_v28  ;;  %3798 = vmatpush1.bf16.msra.mxu1 %v4898_v29  ;;  %v4982_v28 = vld [vmem:[#allocation6 + $0x4c8] ss:$16 sps:$4 sm:$0xff]   ;;  %v4987_v29 = vld [vmem:[#allocation6 + $0x4e4] ss:$16 sps:$4 sm:$0xff]  }
 0x1af   :  { %3635 = vmatprep.subr.bf16.mxu0 %v4903_v30  ;;  %3799 = vmatprep.subr.bf16.mxu1 %v4906_v31  ;;  %v4990_v30 = vld [vmem:[#allocation6 + $0x4ec] ss:$16 sps:$4 sm:$0xff]   ;;  %v4985_v31 = vld [vmem:[#allocation6 + $0x4e0] ss:$16 sps:$4 sm:$0xff]  }
 0x1b2   :  { %3636 = vmatpush1.bf16.msra.mxu0 %v4901_v32  ;;  %3800 = vmatpush1.bf16.msra.mxu1 %v4904_v33  ;;  %v4988_v32 = vld [vmem:[#allocation6 + $0x4e8] ss:$16 sps:$4 sm:$0xff]   ;;  %v4993_v33 = vld [vmem:[#allocation6 + $0x504] ss:$16 sps:$4 sm:$0xff]  }
 0x1b3   :  { %3637 = vmatprep.subr.bf16.mxu0 %v4909_v34  ;;  %3801 = vmatprep.subr.bf16.mxu1 %v4912_v36  ;;  %v4996_v34 = vld [vmem:[#allocation6 + $0x50c] ss:$16 sps:$4 sm:$0xff]   ;;  %v4991_v36 = vld [vmem:[#allocation6 + $0x500] ss:$16 sps:$4 sm:$0xff]  }
 0x1b6   :  { %3638 = vmatpush1.bf16.msra.mxu0 %v4907_v37  ;;  %3802 = vmatpush1.bf16.msra.mxu1 %v4910_v38  ;;  %v4994_v37 = vld [vmem:[#allocation6 + $0x508] ss:$16 sps:$4 sm:$0xff]   ;;  %v4999_v38 = vld [vmem:[#allocation6 + $0x524] ss:$16 sps:$4 sm:$0xff]  }
 0x1b7   :  { %3639 = vmatprep.subr.bf16.mxu0 %v4915_v39  ;;  %3803 = vmatprep.subr.bf16.mxu1 %v4918_v40  ;;  %v5002_v39 = vld [vmem:[#allocation6 + $0x52c] ss:$16 sps:$4 sm:$0xff]   ;;  %v4997_v40 = vld [vmem:[#allocation6 + $0x520] ss:$16 sps:$4 sm:$0xff]  }
 0x1ba   :  { %3640 = vmatpush1.bf16.msra.mxu0 %v4913_v41  ;;  %3804 = vmatpush1.bf16.msra.mxu1 %v4916_v42  ;;  %v5000_v41 = vld [vmem:[#allocation6 + $0x528] ss:$16 sps:$4 sm:$0xff]   ;;  %v5005_v42 = vld [vmem:[#allocation6 + $0x544] ss:$16 sps:$4 sm:$0xff]  }
 0x1bb   :  { %3641 = vmatprep.subr.bf16.mxu0 %v4921_v43  ;;  %3805 = vmatprep.subr.bf16.mxu1 %v4924_v44  ;;  %v5008_v43 = vld [vmem:[#allocation6 + $0x54c] ss:$16 sps:$4 sm:$0xff]   ;;  %v5003_v44 = vld [vmem:[#allocation6 + $0x540] ss:$16 sps:$4 sm:$0xff]  }
 0x1be   :  { %3642 = vmatpush1.bf16.msra.mxu0 %v4919_v45  ;;  %3806 = vmatpush1.bf16.msra.mxu1 %v4922_v46  ;;  %v5006_v45 = vld [vmem:[#allocation6 + $0x548] ss:$16 sps:$4 sm:$0xff]   ;;  %v5011_v46 = vld [vmem:[#allocation6 + $0x564] ss:$16 sps:$4 sm:$0xff]  }
 0x1bf   :  { %3643 = vmatprep.subr.bf16.mxu0 %v4927_v47  ;;  %3807 = vmatprep.subr.bf16.mxu1 %v4930_v48  ;;  %v5014_v47 = vld [vmem:[#allocation6 + $0x56c] ss:$16 sps:$4 sm:$0xff]   ;;  %v5009_v48 = vld [vmem:[#allocation6 + $0x560] ss:$16 sps:$4 sm:$0xff]  }
 0x1c2   :  { %3644 = vmatpush1.bf16.msra.mxu0 %v4925_v49  ;;  %3808 = vmatpush1.bf16.msra.mxu1 %v4928_v50  ;;  %v5012_v49 = vld [vmem:[#allocation6 + $0x568] ss:$16 sps:$4 sm:$0xff]   ;;  %v5017_v50 = vld [vmem:[#allocation6 + $0x584] ss:$16 sps:$4 sm:$0xff]  }
 0x1c3   :  { %3645 = vmatprep.subr.bf16.mxu0 %v4933_v51  ;;  %3809 = vmatprep.subr.bf16.mxu1 %v4936_v52  ;;  %v5020_v51 = vld [vmem:[#allocation6 + $0x58c] ss:$16 sps:$4 sm:$0xff]   ;;  %v5015_v52 = vld [vmem:[#allocation6 + $0x580] ss:$16 sps:$4 sm:$0xff]  }
 0x1c6   :  { %3646 = vmatpush1.bf16.msra.mxu0 %v4931_v53  ;;  %3810 = vmatpush1.bf16.msra.mxu1 %v4934_v54  ;;  %v5018_v53 = vld [vmem:[#allocation6 + $0x588] ss:$16 sps:$4 sm:$0xff]   ;;  %v5023_v54 = vld [vmem:[#allocation6 + $0x5a4] ss:$16 sps:$4 sm:$0xff]  }
 0x1c7   :  { %3647 = vmatprep.subr.bf16.mxu0 %v4939_v55  ;;  %3811 = vmatprep.subr.bf16.mxu1 %v4942_v57  ;;  %v5026_v55 = vld [vmem:[#allocation6 + $0x5ac] ss:$16 sps:$4 sm:$0xff]   ;;  %v5021_v57 = vld [vmem:[#allocation6 + $0x5a0] ss:$16 sps:$4 sm:$0xff]  }
 0x1ca   :  { %3648 = vmatpush1.bf16.msra.mxu0 %v4937_v58  ;;  %3812 = vmatpush1.bf16.msra.mxu1 %v4940_v59  ;;  %v5024_v58 = vld [vmem:[#allocation6 + $0x5a8] ss:$16 sps:$4 sm:$0xff]   ;;  %v5029_v59 = vld [vmem:[#allocation6 + $0x5c4] ss:$16 sps:$4 sm:$0xff]  }
 0x1cb   :  { %3658 = vmatprep.subr.bf16.mxu0 %v4945_v62  ;;  %3822 = vmatprep.subr.bf16.mxu1 %v4948_v63  ;;  %v5027_v62 = vld [vmem:[#allocation6 + $0x5c0] ss:$16 sps:$4 sm:$0xff]   ;;  %v5030_v63 = vld [vmem:[#allocation6 + $0x5c8] ss:$16 sps:$4 sm:$0xff]  }
 0x1cd   :  { %3650 = vmatmul.mubr.bf16.vlgmr.msra.gmra.mrb[64].mxu0 %v2012_v5  ;;  %3814 = vmatmul.mubr.bf16.vlgmr.msra.gmra.mrb[64].mxu1 %v2012_v5  ;;  %v5033_v5 = vld [vmem:[#allocation6 + $0x5e0] ss:$16 sps:$4 sm:$0xff]  }
 0x1ce   :  { %3659 = vmatpush1.bf16.msra.mxu0 %v4943_v4  ;;  %3690 = vmatprep.mubr.bf16.mxu0 %v2015_v7  ;;  %v5038_v4 = vld [vmem:[#allocation6 + $0x5ec] ss:$16 sps:$4 sm:$0xff]  }
 0x1cf   :  { %3823 = vmatpush1.bf16.msra.mxu1 %v4946_v6  ;;  %3854 = vmatprep.mubr.bf16.mxu1 %v2015_v7  ;;  %v2006_v6 = vmul.f32 0.125, %v5494_v56  ;;  %v5036_v7 = vld [vmem:[#allocation6 + $0x5e8] ss:$16 sps:$4 sm:$0xff]   ;;  %v5045_v56 = vld [vmem:[#allocation6 + $0x620] ss:$16 sps:$4 sm:$0xff]  }
 0x1d0   :  { %3660 = vmatprep.subr.bf16.mxu0 %v4951_v8  ;;  %3824 = vmatprep.subr.bf16.mxu1 %v4954_v9  ;;  %v5041_v8 = vld [vmem:[#allocation6 + $0x604] ss:$16 sps:$4 sm:$0xff]   ;;  %v5044_v9 = vld [vmem:[#allocation6 + $0x60c] ss:$16 sps:$4 sm:$0xff]  }
 0x1d2   :  { %3661 = vmatpush1.bf16.msra.mxu0 %v4949_v35  ;;  %v2009_v35 = vmul.f32 0.125, %v5503_v3  ;;  %v5056_v3 = vld [vmem:[#allocation6 + $0x64c] ss:$16 sps:$4 sm:$0xff]  }
 0x1d3   :  { %3825 = vmatpush1.bf16.msra.mxu1 %v4952_v10  ;;  %3662 = vmatprep.subr.bf16.mxu0 %v4957_v11  ;;  %v5039_v10 = vld [vmem:[#allocation6 + $0x600] ss:$16 sps:$4 sm:$0xff]   ;;  %v2014_v11 = vpack.c.bf16 %v2006_v6, %v2006_v6 }
 0x1d4   :  { %3826 = vmatprep.subr.bf16.mxu1 %v4960_v1  ;;  %v5042_v1 = vld [vmem:[#allocation6 + $0x608] ss:$16 sps:$4 sm:$0xff]   ;;  %v5123_v6 = vld [vmem:[#allocation6 + $0x7c0] ss:$16 sps:$4 sm:$0xff]  }
 0x1d6   :  { %3663 = vmatpush1.bf16.msra.mxu0 %v4955_v12  ;;  %v5047_v12 = vld [vmem:[#allocation6 + $0x624] ss:$16 sps:$4 sm:$0xff]  }
 0x1d7   :  { %3827 = vmatpush1.bf16.msra.mxu1 %v4958_v0  ;;  %3664 = vmatprep.subr.bf16.mxu0 %v4963_v13  ;;  %v2017_v0 = vpack.c.bf16 %v2009_v35, %v2009_v35  ;;  %v5050_v13 = vld [vmem:[#allocation6 + $0x62c] ss:$16 sps:$4 sm:$0xff]   ;;  %v5129_v35 = vld [vmem:[#allocation6 + $0x7e0] ss:$16 sps:$4 sm:$0xff]  }
 0x1d8   :  { %3828 = vmatprep.subr.bf16.mxu1 %v4966_v14  ;;  %v5048_v14 = vld [vmem:[#allocation6 + $0x628] ss:$16 sps:$4 sm:$0xff]  }
 0x1da   :  { %3665 = vmatpush1.bf16.msra.mxu0 %v4961_v22  ;;  %v5053_v22 = vld [vmem:[#allocation6 + $0x644] ss:$16 sps:$4 sm:$0xff]  }
 0x1db   :  { %3829 = vmatpush1.bf16.msra.mxu1 %v4964_v15  ;;  %3666 = vmatprep.subr.bf16.mxu0 %v4969_v16  ;;  %v5051_v15 = vld [vmem:[#allocation6 + $0x640] ss:$16 sps:$4 sm:$0xff]   ;;  %v5054_v16 = vld [vmem:[#allocation6 + $0x648] ss:$16 sps:$4 sm:$0xff]  }
 0x1dc   :  { %3830 = vmatprep.subr.bf16.mxu1 %v4972_v17  ;;  %v5059_v17 = vld [vmem:[#allocation6 + $0x664] ss:$16 sps:$4 sm:$0xff]  }
 0x1de   :  { %3667 = vmatpush1.bf16.msra.mxu0 %v4967_v18  ;;  %v5062_v18 = vld [vmem:[#allocation6 + $0x66c] ss:$16 sps:$4 sm:$0xff]  }
 0x1df   :  { %3831 = vmatpush1.bf16.msra.mxu1 %v4970_v19  ;;  %3668 = vmatprep.subr.bf16.mxu0 %v4975_v20  ;;  %v5057_v19 = vld [vmem:[#allocation6 + $0x660] ss:$16 sps:$4 sm:$0xff]   ;;  %v5060_v20 = vld [vmem:[#allocation6 + $0x668] ss:$16 sps:$4 sm:$0xff]  }
 0x1e0   :  { %3832 = vmatprep.subr.bf16.mxu1 %v4978_v21  ;;  %v5065_v21 = vld [vmem:[#allocation6 + $0x684] ss:$16 sps:$4 sm:$0xff]  }
 0x1e2   :  { %3669 = vmatpush1.bf16.msra.mxu0 %v4973_v23  ;;  %v5068_v23 = vld [vmem:[#allocation6 + $0x68c] ss:$16 sps:$4 sm:$0xff]  }
 0x1e3   :  { %3833 = vmatpush1.bf16.msra.mxu1 %v4976_v24  ;;  %3670 = vmatprep.subr.bf16.mxu0 %v4981_v25  ;;  %v5063_v24 = vld [vmem:[#allocation6 + $0x680] ss:$16 sps:$4 sm:$0xff]   ;;  %v5066_v25 = vld [vmem:[#allocation6 + $0x688] ss:$16 sps:$4 sm:$0xff]  }
 0x1e4   :  { %3834 = vmatprep.subr.bf16.mxu1 %v4984_v26  ;;  %v5071_v26 = vld [vmem:[#allocation6 + $0x6a4] ss:$16 sps:$4 sm:$0xff]  }
 0x1e6   :  { %3671 = vmatpush1.bf16.msra.mxu0 %v4979_v27  ;;  %v5074_v27 = vld [vmem:[#allocation6 + $0x6ac] ss:$16 sps:$4 sm:$0xff]  }
 0x1e7   :  { %3835 = vmatpush1.bf16.msra.mxu1 %v4982_v28  ;;  %3672 = vmatprep.subr.bf16.mxu0 %v4987_v29  ;;  %v5069_v28 = vld [vmem:[#allocation6 + $0x6a0] ss:$16 sps:$4 sm:$0xff]   ;;  %v5072_v29 = vld [vmem:[#allocation6 + $0x6a8] ss:$16 sps:$4 sm:$0xff]  }
 0x1e8   :  { %3836 = vmatprep.subr.bf16.mxu1 %v4990_v30  ;;  %v5077_v30 = vld [vmem:[#allocation6 + $0x6c4] ss:$16 sps:$4 sm:$0xff]  }
 0x1ea   :  { %3673 = vmatpush1.bf16.msra.mxu0 %v4985_v31  ;;  %v5080_v31 = vld [vmem:[#allocation6 + $0x6cc] ss:$16 sps:$4 sm:$0xff]  }
 0x1eb   :  { %3837 = vmatpush1.bf16.msra.mxu1 %v4988_v32  ;;  %3674 = vmatprep.subr.bf16.mxu0 %v4993_v33  ;;  %v5075_v32 = vld [vmem:[#allocation6 + $0x6c0] ss:$16 sps:$4 sm:$0xff]   ;;  %v5078_v33 = vld [vmem:[#allocation6 + $0x6c8] ss:$16 sps:$4 sm:$0xff]  }
 0x1ec   :  { %3838 = vmatprep.subr.bf16.mxu1 %v4996_v34  ;;  %v5083_v34 = vld [vmem:[#allocation6 + $0x6e4] ss:$16 sps:$4 sm:$0xff]  }
 0x1ee   :  { %3675 = vmatpush1.bf16.msra.mxu0 %v4991_v36  ;;  %v5086_v36 = vld [vmem:[#allocation6 + $0x6ec] ss:$16 sps:$4 sm:$0xff]  }
 0x1ef   :  { %3839 = vmatpush1.bf16.msra.mxu1 %v4994_v37  ;;  %3676 = vmatprep.subr.bf16.mxu0 %v4999_v38  ;;  %v5081_v37 = vld [vmem:[#allocation6 + $0x6e0] ss:$16 sps:$4 sm:$0xff]   ;;  %v5084_v38 = vld [vmem:[#allocation6 + $0x6e8] ss:$16 sps:$4 sm:$0xff]  }
 0x1f0   :  { %3840 = vmatprep.subr.bf16.mxu1 %v5002_v39  ;;  %v5089_v39 = vld [vmem:[#allocation6 + $0x704] ss:$16 sps:$4 sm:$0xff]  }
 0x1f2   :  { %3677 = vmatpush1.bf16.msra.mxu0 %v4997_v40  ;;  %v5092_v40 = vld [vmem:[#allocation6 + $0x70c] ss:$16 sps:$4 sm:$0xff]  }
 0x1f3   :  { %3841 = vmatpush1.bf16.msra.mxu1 %v5000_v41  ;;  %3678 = vmatprep.subr.bf16.mxu0 %v5005_v42  ;;  %v5087_v41 = vld [vmem:[#allocation6 + $0x700] ss:$16 sps:$4 sm:$0xff]   ;;  %v5090_v42 = vld [vmem:[#allocation6 + $0x708] ss:$16 sps:$4 sm:$0xff]  }
 0x1f4   :  { %3842 = vmatprep.subr.bf16.mxu1 %v5008_v43  ;;  %v5095_v43 = vld [vmem:[#allocation6 + $0x724] ss:$16 sps:$4 sm:$0xff]  }
 0x1f6   :  { %3679 = vmatpush1.bf16.msra.mxu0 %v5003_v44  ;;  %v5098_v44 = vld [vmem:[#allocation6 + $0x72c] ss:$16 sps:$4 sm:$0xff]  }
 0x1f7   :  { %3843 = vmatpush1.bf16.msra.mxu1 %v5006_v45  ;;  %3680 = vmatprep.subr.bf16.mxu0 %v5011_v46  ;;  %v5093_v45 = vld [vmem:[#allocation6 + $0x720] ss:$16 sps:$4 sm:$0xff]   ;;  %v5096_v46 = vld [vmem:[#allocation6 + $0x728] ss:$16 sps:$4 sm:$0xff]  }
 0x1f8   :  { %3844 = vmatprep.subr.bf16.mxu1 %v5014_v47  ;;  %v5101_v47 = vld [vmem:[#allocation6 + $0x744] ss:$16 sps:$4 sm:$0xff]  }
 0x1fa   :  { %3681 = vmatpush1.bf16.msra.mxu0 %v5009_v48  ;;  %v5104_v48 = vld [vmem:[#allocation6 + $0x74c] ss:$16 sps:$4 sm:$0xff]  }
 0x1fb   :  { %3845 = vmatpush1.bf16.msra.mxu1 %v5012_v49  ;;  %3682 = vmatprep.subr.bf16.mxu0 %v5017_v50  ;;  %v5099_v49 = vld [vmem:[#allocation6 + $0x740] ss:$16 sps:$4 sm:$0xff]   ;;  %v5102_v50 = vld [vmem:[#allocation6 + $0x748] ss:$16 sps:$4 sm:$0xff]  }
 0x1fc   :  { %3846 = vmatprep.subr.bf16.mxu1 %v5020_v51  ;;  %v5107_v51 = vld [vmem:[#allocation6 + $0x764] ss:$16 sps:$4 sm:$0xff]  }
 0x1fe   :  { %3683 = vmatpush1.bf16.msra.mxu0 %v5015_v52  ;;  %v5110_v52 = vld [vmem:[#allocation6 + $0x76c] ss:$16 sps:$4 sm:$0xff]  }
 0x1ff   :  { %3847 = vmatpush1.bf16.msra.mxu1 %v5018_v53  ;;  %3684 = vmatprep.subr.bf16.mxu0 %v5023_v54  ;;  %v5105_v53 = vld [vmem:[#allocation6 + $0x760] ss:$16 sps:$4 sm:$0xff]   ;;  %v5108_v54 = vld [vmem:[#allocation6 + $0x768] ss:$16 sps:$4 sm:$0xff]  }
 0x200   :  { %3848 = vmatprep.subr.bf16.mxu1 %v5026_v55  ;;  %v5113_v55 = vld [vmem:[#allocation6 + $0x784] ss:$16 sps:$4 sm:$0xff]  }
 0x202   :  { %3685 = vmatpush1.bf16.msra.mxu0 %v5021_v57  ;;  %v5116_v57 = vld [vmem:[#allocation6 + $0x78c] ss:$16 sps:$4 sm:$0xff]  }
 0x203   :  { %3849 = vmatpush1.bf16.msra.mxu1 %v5024_v58  ;;  %3686 = vmatprep.subr.bf16.mxu0 %v5029_v59  ;;  %v5111_v58 = vld [vmem:[#allocation6 + $0x780] ss:$16 sps:$4 sm:$0xff]   ;;  %v5114_v59 = vld [vmem:[#allocation6 + $0x788] ss:$16 sps:$4 sm:$0xff]  }
 0x204   :  { %3850 = vmatprep.subr.bf16.mxu1 %v5032_v60  ;;  %v5119_v60 = vld [vmem:[#allocation6 + $0x7a4] ss:$16 sps:$4 sm:$0xff]  }
 0x206   :  { %3687 = vmatpush1.bf16.msra.mxu0 %v5027_v62  ;;  %v5122_v62 = vld [vmem:[#allocation6 + $0x7ac] ss:$16 sps:$4 sm:$0xff]  }
 0x207   :  { %3851 = vmatpush1.bf16.msra.mxu1 %v5030_v63  ;;  %3688 = vmatprep.subr.bf16.mxu0 %v5035_v2  ;;  %v5117_v63 = vld [vmem:[#allocation6 + $0x7a0] ss:$16 sps:$4 sm:$0xff]   ;;  %v5120_v2 = vld [vmem:[#allocation6 + $0x7a8] ss:$16 sps:$4 sm:$0xff]  }
 0x208   :  { %3852 = vmatprep.subr.bf16.mxu1 %v5038_v4  ;;  %v5125_v4 = vld [vmem:[#allocation6 + $0x7c4] ss:$16 sps:$4 sm:$0xff]  }
 0x20a   :  { %3689 = vmatpush1.bf16.msra.mxu0 %v5033_v5  ;;  %v5128_v5 = vld [vmem:[#allocation6 + $0x7cc] ss:$16 sps:$4 sm:$0xff]  }
 0x20b   :  { %3853 = vmatpush1.bf16.msra.mxu1 %v5036_v7  ;;  %3699 = vmatprep.subr.bf16.mxu0 %v5041_v8  ;;  %v5126_v7 = vld [vmem:[#allocation6 + $0x7c8] ss:$16 sps:$4 sm:$0xff]   ;;  %v5131_v8 = vld [vmem:[#allocation6 + $0x7e4] ss:$16 sps:$4 sm:$0xff]  }
 0x20c   :  { %3863 = vmatprep.subr.bf16.mxu1 %v5044_v9  ;;  %v5134_v9 = vld [vmem:[#allocation6 + $0x7ec] ss:$16 sps:$4 sm:$0xff]  }
 0x20d   :  { %3691 = vmatmul.mubr.bf16.vlgmr.msra.gmra.mrb[64].mxu0 %v2014_v11 }
 0x20e   :  { %3855 = vmatmul.mubr.bf16.vlgmr.msra.gmra.mrb[64].mxu1 %v2014_v11  ;;  %3700 = vmatpush1.bf16.msra.mxu0 %v5039_v10  ;;  %v2008_v10 = vmul.f32 0.125, %v5497_v61  ;;  %v5132_v11 = vld [vmem:[#allocation6 + $0x7e8] ss:$16 sps:$4 sm:$0xff]  }
 0x20f   :  { %3731 = vmatprep.mubr.bf16.mxu0 %v2017_v0  ;;  %3864 = vmatpush1.bf16.msra.mxu1 %v5042_v1  ;;  %v5135_v1 = vld [vmem:[#allocation8 + $0x40] sm:$0xff]   ;;  %v5142_v61 = vld [vmem:[#allocation8 + $0x88] sm:$0xff]  }
 0x210   :  { %3895 = vmatprep.mubr.bf16.mxu1 %v2017_v0  ;;  %3701 = vmatprep.subr.bf16.mxu0 %v5047_v12  ;;  %v5136_v12 = vld [vmem:[#allocation8 + $0xc0] sm:$0xff]  }
 0x211   :  { %3865 = vmatprep.subr.bf16.mxu1 %v5050_v13  ;;  %v5137_v0 = vld [vmem:[#allocation8] sm:$0xff]   ;;  %v2016_v13 = vpack.c.bf16 %v2008_v10, %v2008_v10 }
 0x212   :  { %3702 = vmatpush1.bf16.msra.mxu0 %v5045_v56  ;;  %v5138_v56 = vld [vmem:[#allocation8 + $0x80] sm:$0xff]  }
 0x213   :  { %3866 = vmatpush1.bf16.msra.mxu1 %v5048_v14  ;;  %3703 = vmatprep.subr.bf16.mxu0 %v5053_v22  ;;  %v5139_v14 = vld [vmem:[#allocation8 + $0x48] sm:$0xff]  }
 0x214   :  { %3867 = vmatprep.subr.bf16.mxu1 %v5056_v3  ;;  %v5140_v22 = vld [vmem:[#allocation8 + $0xc8] sm:$0xff]  }
 0x215   :  { %v5141_v3 = vld [vmem:[#allocation8 + $0x8] sm:$0xff]  }
 0x216   :  { %3704 = vmatpush1.bf16.msra.mxu0 %v5051_v15  ;;  %v5143_v15 = vld [vmem:[#allocation8 + $0x50] sm:$0xff]  }
 0x217   :  { %3868 = vmatpush1.bf16.msra.mxu1 %v5054_v16  ;;  %3705 = vmatprep.subr.bf16.mxu0 %v5059_v17  ;;  %v5144_v16 = vld [vmem:[#allocation8 + $0xd0] sm:$0xff]  }
 0x218   :  { %3869 = vmatprep.subr.bf16.mxu1 %v5062_v18  ;;  %v5145_v17 = vld [vmem:[#allocation8 + $0x10] sm:$0xff]  }
 0x219   :  { %v5146_v18 = vld [vmem:[#allocation8 + $0x90] sm:$0xff]  }
 0x21a   :  { %3706 = vmatpush1.bf16.msra.mxu0 %v5057_v19  ;;  %v5147_v19 = vld [vmem:[#allocation8 + $0x58] sm:$0xff]  }
 0x21b   :  { %3870 = vmatpush1.bf16.msra.mxu1 %v5060_v20  ;;  %3707 = vmatprep.subr.bf16.mxu0 %v5065_v21  ;;  %v5148_v20 = vld [vmem:[#allocation8 + $0xd8] sm:$0xff]  }
 0x21c   :  { %3871 = vmatprep.subr.bf16.mxu1 %v5068_v23  ;;  %v5149_v21 = vld [vmem:[#allocation8 + $0x18] sm:$0xff]  }
 0x21d   :  { %v5150_v23 = vld [vmem:[#allocation8 + $0x98] sm:$0xff]  }
 0x21e   :  { %3708 = vmatpush1.bf16.msra.mxu0 %v5063_v24  ;;  %v5151_v24 = vld [vmem:[#allocation8 + $0x60] sm:$0xff]  }
 0x21f   :  { %3872 = vmatpush1.bf16.msra.mxu1 %v5066_v25  ;;  %3709 = vmatprep.subr.bf16.mxu0 %v5071_v26  ;;  %v5152_v25 = vld [vmem:[#allocation8 + $0xe0] sm:$0xff]  }
 0x220   :  { %3873 = vmatprep.subr.bf16.mxu1 %v5074_v27  ;;  %v5153_v26 = vld [vmem:[#allocation8 + $0x20] sm:$0xff]  }
 0x221   :  { %v5154_v27 = vld [vmem:[#allocation8 + $0xa0] sm:$0xff]  }
 0x222   :  { %3710 = vmatpush1.bf16.msra.mxu0 %v5069_v28  ;;  %v5155_v28 = vld [vmem:[#allocation8 + $0x68] sm:$0xff]  }
 0x223   :  { %3874 = vmatpush1.bf16.msra.mxu1 %v5072_v29  ;;  %3711 = vmatprep.subr.bf16.mxu0 %v5077_v30  ;;  %v5156_v29 = vld [vmem:[#allocation8 + $0xe8] sm:$0xff]  }
 0x224   :  { %3875 = vmatprep.subr.bf16.mxu1 %v5080_v31  ;;  %v5157_v30 = vld [vmem:[#allocation8 + $0x28] sm:$0xff]  }
 0x225   :  { %v5158_v31 = vld [vmem:[#allocation8 + $0xa8] sm:$0xff]  }
 0x226   :  { %3712 = vmatpush1.bf16.msra.mxu0 %v5075_v32  ;;  %v5159_v32 = vld [vmem:[#allocation8 + $0x70] sm:$0xff]  }
 0x227   :  { %3876 = vmatpush1.bf16.msra.mxu1 %v5078_v33  ;;  %3713 = vmatprep.subr.bf16.mxu0 %v5083_v34  ;;  %v5160_v33 = vld [vmem:[#allocation8 + $0xf0] sm:$0xff]  }
 0x228   :  { %3877 = vmatprep.subr.bf16.mxu1 %v5086_v36  ;;  %v5161_v34 = vld [vmem:[#allocation8 + $0x30] sm:$0xff]  }
 0x229   :  { %v5162_v36 = vld [vmem:[#allocation8 + $0xb0] sm:$0xff]  }
 0x22a   :  { %3714 = vmatpush1.bf16.msra.mxu0 %v5081_v37  ;;  %v5163_v37 = vld [vmem:[#allocation8 + $0x78] sm:$0xff]  }
 0x22b   :  { %3878 = vmatpush1.bf16.msra.mxu1 %v5084_v38  ;;  %3715 = vmatprep.subr.bf16.mxu0 %v5089_v39  ;;  %v5164_v38 = vld [vmem:[#allocation8 + $0xf8] sm:$0xff]  }
 0x22c   :  { %3879 = vmatprep.subr.bf16.mxu1 %v5092_v40  ;;  %v5165_v39 = vld [vmem:[#allocation8 + $0x38] sm:$0xff]  }
 0x22d   :  { %v5166_v40 = vld [vmem:[#allocation8 + $0xb8] sm:$0xff]  }
 0x22e   :  { %3716 = vmatpush1.bf16.msra.mxu0 %v5087_v41  ;;  %v2276_v41 = vlaneseq }
 0x22f   :  { %3880 = vmatpush1.bf16.msra.mxu1 %v5090_v42  ;;  %3717 = vmatprep.subr.bf16.mxu0 %v5095_v43 }
 0x230   :  { %3881 = vmatprep.subr.bf16.mxu1 %v5098_v44  ;;  %v2277_v42 = vshrl.u32 %v2276_v41, 7  ;;  %v2274_v44 = vld [vmem:[%s5530_s2] sm:$0xf] }
 0x232   :  { %3718 = vmatpush1.bf16.msra.mxu0 %v5093_v45  ;;  %v2278_v43 = vsub.s32 0, %v2277_v42  ;;  %v2286_v45 = vsub.s32 2, %v2277_v42 }
 0x233   :  { %3882 = vmatpush1.bf16.msra.mxu1 %v5096_v46  ;;  %3719 = vmatprep.subr.bf16.mxu0 %v5101_v47  ;;  %v2282_v46 = vsub.s32 1, %v2277_v42  ;;  %v2290_v47 = vsub.s32 3, %v2277_v42 }
 0x234   :  { %3883 = vmatprep.subr.bf16.mxu1 %v5104_v48  ;;  %v2279_v48 = vrot.slane %v2274_v44, %v2278_v43 }
 0x236   :  { %3720 = vmatpush1.bf16.msra.mxu0 %v5099_v49  ;;  %v2287_v49 = vrot.slane %v2274_v44, %v2286_v45 }
 0x237   :  { %3884 = vmatpush1.bf16.msra.mxu1 %v5102_v50  ;;  %3721 = vmatprep.subr.bf16.mxu0 %v5107_v51  ;;  %v2283_v50 = vrot.slane %v2274_v44, %v2282_v46  ;;  %v2291_v51 = vrot.slane %v2274_v44, %v2290_v47 }
 0x238   :  { %3885 = vmatprep.subr.bf16.mxu1 %v5110_v52 }
 0x23a   :  { %3722 = vmatpush1.bf16.msra.mxu0 %v5105_v53 }
 0x23b   :  { %3886 = vmatpush1.bf16.msra.mxu1 %v5108_v54  ;;  %3723 = vmatprep.subr.bf16.mxu0 %v5113_v55 }
 0x23c   :  { %3887 = vmatprep.subr.bf16.mxu1 %v5116_v57 }
 0x23e   :  { %3724 = vmatpush1.bf16.msra.mxu0 %v5111_v58 }
 0x23f   :  { %3888 = vmatpush1.bf16.msra.mxu1 %v5114_v59  ;;  %3725 = vmatprep.subr.bf16.mxu0 %v5119_v60 }
 0x240   :  { %3889 = vmatprep.subr.bf16.mxu1 %v5122_v62 }
 0x242   :  { %3726 = vmatpush1.bf16.msra.mxu0 %v5117_v63 }
 0x243   :  { %3890 = vmatpush1.bf16.msra.mxu1 %v5120_v2  ;;  %3727 = vmatprep.subr.bf16.mxu0 %v5125_v4 }
 0x244   :  { %3891 = vmatprep.subr.bf16.mxu1 %v5128_v5 }
 0x246   :  { %3728 = vmatpush1.bf16.msra.mxu0 %v5123_v6 }
 0x247   :  { %3892 = vmatpush1.bf16.msra.mxu1 %v5126_v7  ;;  %3729 = vmatprep.subr.bf16.mxu0 %v5131_v8 }
 0x248   :  { %3893 = vmatprep.subr.bf16.mxu1 %v5134_v9 }
 0x24a   :  { %3730 = vmatpush1.bf16.msra.mxu0 %v5129_v35 }
 0x24b   :  { %3894 = vmatpush1.bf16.msra.mxu1 %v5132_v11  ;;  %4667 = vmatprep.subr.bf16.mxu0 %v5135_v1 }
 0x24c   :  { %4689 = vmatprep.subr.bf16.mxu1 %v5136_v12 }
 0x24d   :  { %3732 = vmatmul.mubr.bf16.vlgmr.msra.gmra.mrb[64].mxu0 %v2016_v13 }
 0x24e   :  { %3896 = vmatmul.mubr.bf16.vlgmr.msra.gmra.mrb[64].mxu1 %v2016_v13  ;;  %4668 = vmatpush3.bf16.msra.mxu0 %v5137_v0  ;;  %v4634_v0 = vld [vmem:[%s5532_s4] ss:$0 sm:$0xff]  ;;  %s5276_s4 = smov [#allocation9]  }
 0x24f   :  { %4690 = vmatpush3.bf16.msra.mxu1 %v5138_v56  ;;  %4669 = vmatprep.subr.bf16.mxu0 %v5139_v14  ;;  %s4272_s10 = sshll.u32 %s5276_s4, 4  ;;  %s4273_s10 = int_to_ptr.vmem [resolvable:$true] %s4272_s10 }
 0x250   :  { %4691 = vmatprep.subr.bf16.mxu1 %v5140_v22  ;;  %s5237_s11 = scalar_lea.vmem %s4273_s10, 128  ;;  %p5242_p11 = scmp.lt.s32.totalorder %s4273_s10, %s4273_s10 }
 0x251   :  { %p5238_p10 = scmp.ne.s32.totalorder %s4273_s10, %s5237_s11  ;;  %p5243_p12 = scmp.lt.s32.totalorder %s5237_s11, %s5237_s11 }
 0x252   :  { %4670 = vmatpush3.bf16.msra.mxu0 %v5141_v3 }
 0x253   :  { %4692 = vmatpush3.bf16.msra.mxu1 %v5142_v61  ;;  %4671 = vmatprep.subr.bf16.mxu0 %v5143_v15  ;;  %p5244_p13 = por %p5243_p12, %p5242_p11 }
 0x254   :  { %4693 = vmatprep.subr.bf16.mxu1 %v5144_v16 }
 0x255   :  { %p5245_p0 = pnand %p5244_p13, %p5238_p10 }
 0x256   :  { %4672 = vmatpush3.bf16.msra.mxu0 %v5145_v17 }
 0x257   :  { %4694 = vmatpush3.bf16.msra.mxu1 %v5146_v18  ;;  %4673 = vmatprep.subr.bf16.mxu0 %v5147_v19 }
 0x258   :  { %4695 = vmatprep.subr.bf16.mxu1 %v5148_v20 }
 0x25a   :  { %4674 = vmatpush3.bf16.msra.mxu0 %v5149_v21 }
 0x25b   :  { %4696 = vmatpush3.bf16.msra.mxu1 %v5150_v23  ;;  %4675 = vmatprep.subr.bf16.mxu0 %v5151_v24 }
 0x25c   :  { %4697 = vmatprep.subr.bf16.mxu1 %v5152_v25 }
 0x25e   :  { %4676 = vmatpush3.bf16.msra.mxu0 %v5153_v26 }
 0x25f   :  { %4698 = vmatpush3.bf16.msra.mxu1 %v5154_v27  ;;  %4677 = vmatprep.subr.bf16.mxu0 %v5155_v28 }
 0x260   :  { %4699 = vmatprep.subr.bf16.mxu1 %v5156_v29 }
 0x262   :  { %4678 = vmatpush3.bf16.msra.mxu0 %v5157_v30 }
 0x263   :  { %4700 = vmatpush3.bf16.msra.mxu1 %v5158_v31  ;;  %4679 = vmatprep.subr.bf16.mxu0 %v5159_v32 }
 0x264   :  { %4701 = vmatprep.subr.bf16.mxu1 %v5160_v33 }
 0x266   :  { %4680 = vmatpush3.bf16.msra.mxu0 %v5161_v34 }
 0x267   :  { %4702 = vmatpush3.bf16.msra.mxu1 %v5162_v36  ;;  %4681 = vmatprep.subr.bf16.mxu0 %v5163_v37 }
 0x268   :  { %4703 = vmatprep.subr.bf16.mxu1 %v5164_v38 }
 0x26a   :  { %4682 = vmatpush3.bf16.msra.mxu0 %v5165_v39 }
 0x26b   :  { %4704 = vmatpush3.bf16.msra.mxu1 %v5166_v40 }
 0x320   :  { %v3733_v52 = vpop.f32.mrb[64].mxu0 }
 0x321   :  { %v4711_v53 = vadd.f32 %v3733_v52, %v2279_v48  ;;  %v3897_v54 = vpop.f32.mrb[64].mxu1  ;;  %v3735_v55 = vpop.f32.mrb[65].mxu0 }
 0x322   :  { %v4713_v57 = vadd.f32 %v3897_v54, %v2287_v49  ;;  %v4712_v58 = vadd.f32 %v3735_v55, %v2283_v50  ;;  %v3899_v59 = vpop.f32.mrb[65].mxu1  ;;  %v3737_v60 = vpop.f32.mrb[66].mxu0 }
 0x323   :  { %v3904_v62 = vmax.f32 %v4711_v53, 0.0  ;;  %v4714_v63 = vadd.f32 %v3899_v59, %v2291_v51  ;;  %v3901_v2 = vpop.f32.mrb[66].mxu1  ;;  %v3738_v4 = vpop.f32.mrb[67].mxu0 }
 0x324   :  { %v3906_v5 = vmax.f32 %v4713_v57, 0.0  ;;  %v3905_v6 = vmax.f32 %v4712_v58, 0.0  ;;  %v3902_v7 = vpop.f32.mrb[67].mxu1 }
 0x325   :  { %v3907_v8 = vmax.f32 %v4714_v63, 0.0  ;;  %v3908_v35 = vpack.c.bf16 %v3904_v62, %v3904_v62 }
 0x326   :  { %v3909_v9 = vpack.c.bf16 %v3905_v6, %v3905_v6  ;;  %v3910_v11 = vpack.c.bf16 %v3906_v5, %v3906_v5 }
 0x327   :  { %v3911_v10 = vpack.c.bf16 %v3907_v8, %v3907_v8 }
 0x328   :  { %4207 = vmatprep.mubr.bf16.mxu0 %v3909_v9 }
 0x329   :  { %4247 = vmatprep.mubr.bf16.mxu1 %v3911_v10  ;;  %4208 = vmatmul.mubr.bf16.vlgmr.msra.gmra.mrb[68].mxu0 %v3908_v35 }
 0x32a   :  { %4248 = vmatmul.mubr.bf16.vlgmr.msra.gmra.mrb[68].mxu1 %v3910_v11 }
 0x3fc   :  { %v4683_v1 = vpop.f32.mrb[68].mxu0 }
 0x3fd   :  { %v4705_v12 = vpop.f32.mrb[68].mxu1  ;;  %v4684_v13 = vpop.f32.mrb[69].mxu0 }
 0x3fe   :  { %v4685_v56 = vadd.f32 %v4684_v13, %v4683_v1  ;;  %v4706_v14 = vpop.f32.mrb[69].mxu1  ;;  %v4686_v22 = vpop.f32.mrb[70].mxu0 }
 0x3ff   :  { %v4707_v3 = vadd.f32 %v4706_v14, %v4705_v12  ;;  %v4708_v61 = vpop.f32.mrb[70].mxu1  ;;  %v4687_v15 = vpop.f32.mrb[71].mxu0 }
 0x400   :  { %v4210_v16 = vadd.f32 %v4685_v56, %v4634_v0  ;;  %v4709_v17 = vpop.f32.mrb[71].mxu1 }
 0x402   :  { %v4250_v18 = vadd.f32 %v4707_v3, %v4210_v16 }
 0x404   :  { %4255 = vmax.xlane.f32.xlu0 %v4250_v18 }
 0x491   :  { %v4256_v19 = vpop.xlane.xlu0 %4255 }
 0x492   :  { %v4257_v20 = vsub.f32 %v4250_v18, %v4256_v19 }
 0x494   :  { %v4258_v21 = vmul.f32 1.442695, %v4257_v20 }
 0x496   :  { %5167 = vpow2.f32 %v4258_v21 }
 0x4a0   :  { %v5168_v23 = vpop.eup %5167 }
 0x4a1   :  { %4260 = vadd.xlane.f32.xlu0 %v5168_v23 }
 0x52e   :  { %v4261_v24 = vpop.xlane.xlu0 %4260 }
 0x52f   :  { %5169 = vlog2.f32 %v4261_v24 }
 0x539   :  { %v5170_v25 = vpop.eup %5169 }
 0x53a   :  { %v4263_v26 = vmul.f32 0.6931472, %v5170_v25 }
 0x53c   :  { %v4264_v27 = vsub.f32 %v4257_v20, %v4263_v26 }
 0x53e   :  { %4265 = vst [vmem:[#allocation9] sm:$0xff] %v4264_v27 }
 0x53f   :  { %5248 = shalt.err (!%p5245_p0)
}
 0x540   :  { %s5249_s14 = scalar_lea.hbm %s5533_s5, 128 }
 0x541   :  { %p5250_p1 = scmp.ne.s32.totalorder %s5533_s5, %s5249_s14  ;;  %p5253_p2 = scmp.lt.u32.totalorder %s5249_s14, %s5533_s5 }
 0x543   :  { %p5255_p3 = pnand %p5253_p2, %p5250_p1 }
 0x545   :  { %5258 = shalt.err (!%p5255_p3)
}
 0x546   :  { %4275 = dma.vmem_to_hbm [thread:$0]  %s4273_s10, 128, %s5533_s5, [#allocation5]  }
 0x547   :  { %5263 = dma.done.wait [#allocation5], 128  }
 0x548   :  { %5264 = vsyncadd [#allocation5], 4294967168 }
 0x549   :  { %4279 = vsyncpa [#allocation4], 1 }
 0x54a   :  { %4280 = vsyncpa [#allocation7], 1 }
 0x54b   :  { %4281 = vsyncpa [#allocation5], 1 }

</bundles_post_ra>
